<compile_context>
chip_gen: v6e
topology: v6e:2x2x1
jax: 0.10.0
libtpu: 0.0.40
codegen_flags: <defaults>
</compile_context>

<pallas_src>
import numpy as np
import jax
import jax.numpy as jnp
from jax.experimental import pallas as pl
from jax.experimental.pallas import tpu as pltpu

EPS = 1e-5

_COMPILER_PARAMS = pltpu.CompilerParams(
    dimension_semantics=("parallel",),          # batch axis: independent per image
    vmem_limit_bytes=48 * 1024 * 1024,          # explicit budget (fits v7x's 64 MiB)
)


# -----------------------------------------------------------------------------
# Kernels
# -----------------------------------------------------------------------------
def _make_stage1_kernel(OH, OW, OHp, Cin, Cout):
    """conv1 (3x3, stride 2, pad 1) + bias + ReLU  and  downsample conv (1x1, stride 2).

    Emits raw (pre-BN) activations plus per-image partial BN sums / sums-of-squares.
    Input is the 2x2 phase-split padded image, phases stacked along rows:
      ph[p*OHp + r, c, :] == x_pad[2*r + p//2, 2*c + p%2, :]
    """
    OHW = OH * OW

    def kernel(ph_ref, w1_ref, b1_ref, wd_ref, y1_ref, yd_ref, s1_ref, sd_ref):
        # ---- conv1 as 9 shifted matmuls (no im2col) -------------------------
        acc = jnp.zeros((OHW, Cout), jnp.float32)
        for i in range(3):
            for j in range(3):
                p = 2 * (i % 2) + (j % 2)
                di, dj = i // 2, j // 2
                r0 = p * OHp + di
                tap = ph_ref[0, r0:r0 + OH, dj:dj + OW, :]          # (OH, OW, Cin) f32
                tap = tap.reshape(OHW, Cin).astype(jnp.bfloat16)
                acc = acc + jnp.dot(tap, w1_ref[i * 3 + j],
                                    preferred_element_type=jnp.float32)
        y1 = jnp.maximum(acc + b1_ref[...], 0.0)                     # bias + ReLU (pre-BN1)
        s1_ref[0, 0:1, :] = jnp.sum(y1, axis=0, keepdims=True)       # partial BN1 stats
        s1_ref[0, 1:2, :] = jnp.sum(y1 * y1, axis=0, keepdims=True)
        y1_ref[0] = y1.astype(jnp.bfloat16)

        # ---- downsample branch: 1x1 stride-2 conv == phase (1,1), no bias ----
        r0 = 3 * OHp
        xd = ph_ref[0, r0:r0 + OH, 0:OW, :].reshape(OHW, Cin).astype(jnp.bfloat16)
        yd = jnp.dot(xd, wd_ref[...], preferred_element_type=jnp.float32)
        yd_ref[0] = yd
        sd_ref[0, 0:1, :] = jnp.sum(yd, axis=0, keepdims=True)       # partial BN_ds stats
        sd_ref[0, 1:2, :] = jnp.sum(yd * yd, axis=0, keepdims=True)

    return kernel


def _make_stage2_kernel(OH, OW, Cout):
    """Apply BN1 affine on the fly, then conv2 (3x3, stride 1, pad 1) via a padded
    VMEM scratch (halo built in-kernel, no h1 im2col round-trip)."""
    OHW = OH * OW

    def kernel(y1_ref, sc1_ref, bi1_ref, w2_ref, y2_ref, s2_ref, h1p_ref):
        # Zero the halo scratch: the conv2 zero-padding lives in *normalized* h1 space.
        h1p_ref[...] = jnp.zeros_like(h1p_ref)
        h1 = y1_ref[0].astype(jnp.float32) * sc1_ref[...] + bi1_ref[...]
        h1p_ref[1:OH + 1, 1:OW + 1, :] = h1.reshape(OH, OW, Cout)

        # conv2 as 9 shifted matmuls over the padded scratch.
        # NOTE: conv2's bias is intentionally dropped — a per-channel constant right
        # before BN2 is exactly cancelled by the mean subtraction.
        acc = jnp.zeros((OHW, Cout), jnp.float32)
        for i in range(3):
            for j in range(3):
                tap = h1p_ref[i:i + OH, j:j + OW, :]
                tap = tap.reshape(OHW, Cout).astype(jnp.bfloat16)
                acc = acc + jnp.dot(tap, w2_ref[i * 3 + j],
                                    preferred_element_type=jnp.float32)
        y2_ref[0] = acc
        s2_ref[0, 0:1, :] = jnp.sum(acc, axis=0, keepdims=True)      # partial BN2 stats
        s2_ref[0, 1:2, :] = jnp.sum(acc * acc, axis=0, keepdims=True)

    return kernel


def _finalize_kernel(y2_ref, yd_ref, sc2_ref, bi2_ref, scd_ref, bid_ref, o_ref):
    """out = BN2(y2) + BN_ds(yd), with global stats folded into per-channel scale/bias."""
    o_ref[0] = (y2_ref[0] * sc2_ref[...] + bi2_ref[...]
                + yd_ref[0] * scd_ref[...] + bid_ref[...])


# -----------------------------------------------------------------------------
# Wrapper
# -----------------------------------------------------------------------------
# TODO(synk): the O(N*C) global BatchNorm statistic fold between passes (cross-grid
# reduction of per-image partial sums) is done in plain JAX; it is trivially cheap and
# has no clean single-kernel Pallas equivalent without serializing the batch grid axis.
def _bn_fold(stats, count, gamma, beta):
    s = jnp.sum(stats[:, 0, :], axis=0)
    ss = jnp.sum(stats[:, 1, :], axis=0)
    mean = s / count
    var = ss / count - mean * mean               # one-pass biased variance
    scale = gamma * jax.lax.rsqrt(var + EPS)
    bias = beta - mean * scale
    return scale.reshape(1, -1), bias.reshape(1, -1)


def resblock_forward(x_nchw, params):
    N, Cin, H, W = x_nchw.shape
    assert H % 2 == 0 and W % 2 == 0, "even spatial dims expected (stride-2 convs)"
    Cout = params["w1"].shape[-1]
    OH, OW = H // 2, W // 2
    OHW = OH * OW
    M = N * OHW
    OHp, OWp = OH + 1, OW + 1

    x = jnp.transpose(x_nchw, (0, 2, 3, 1)).astype(jnp.float32)       # NHWC
    xp = jnp.pad(x, ((0, 0), (1, 1), (1, 1), (0, 0)))
    # 2x2 phase split of the padded input (same total bytes as xp, no 9x blow-up):
    # phase p = 2*rp + cp  holds  xp[:, rp::2, cp::2, :].
    phases = jnp.concatenate(
        [xp[:, 0::2, 0::2, :], xp[:, 0::2, 1::2, :],
         xp[:, 1::2, 0::2, :], xp[:, 1::2, 1::2, :]], axis=1)          # (N, 4*OHp, OWp, Cin)

    w1 = params["w1"].reshape(9, Cin, Cout).astype(jnp.bfloat16)
    w2 = params["w2"].reshape(9, Cout, Cout).astype(jnp.bfloat16)
    wd = params["wd"].reshape(Cin, Cout).astype(jnp.bfloat16)
    b1 = params["b1"].reshape(1, Cout).astype(jnp.float32)

    # ---- stage 1: conv1 + bias + ReLU  and  downsample conv, + partial BN stats -----
    y1, yd, s1, sd = pl.pallas_call(
        _make_stage1_kernel(OH, OW, OHp, Cin, Cout),
        grid=(N,),
        in_specs=[
            pl.BlockSpec((1, 4 * OHp, OWp, Cin), lambda n: (n, 0, 0, 0)),
            pl.BlockSpec((9, Cin, Cout), lambda n: (0, 0, 0)),
            pl.BlockSpec((1, Cout), lambda n: (0, 0)),
            pl.BlockSpec((Cin, Cout), lambda n: (0, 0)),
        ],
        out_specs=[
            pl.BlockSpec((1, OHW, Cout), lambda n: (n, 0, 0)),
            pl.BlockSpec((1, OHW, Cout), lambda n: (n, 0, 0)),
            pl.BlockSpec((1, 2, Cout), lambda n: (n, 0, 0)),
            pl.BlockSpec((1, 2, Cout), lambda n: (n, 0, 0)),
        ],
        out_shape=(
            jax.ShapeDtypeStruct((N, OHW, Cout), jnp.bfloat16),   # y1 raw (pre-BN1)
            jax.ShapeDtypeStruct((N, OHW, Cout), jnp.float32),    # yd raw (pre-BN_ds)
            jax.ShapeDtypeStruct((N, 2, Cout), jnp.float32),      # BN1 partial stats
            jax.ShapeDtypeStruct((N, 2, Cout), jnp.float32),      # BN_ds partial stats
        ),
        compiler_params=_COMPILER_PARAMS,
    )(phases, w1, b1, wd)

    sc1, bi1 = _bn_fold(s1, M, params["g1"], params["be1"])
    scd, bid = _bn_fold(sd, M, params["gd"], params["bed"])

    # ---- stage 2: BN1-apply (fused) + conv2, + partial BN2 stats --------------------
    y2, s2 = pl.pallas_call(
        _make_stage2_kernel(OH, OW, Cout),
        grid=(N,),
        in_specs=[
            pl.BlockSpec((1, OHW, Cout), lambda n: (n, 0, 0)),
            pl.BlockSpec((1, Cout), lambda n: (0, 0)),
            pl.BlockSpec((1, Cout), lambda n: (0, 0)),
            pl.BlockSpec((9, Cout, Cout), lambda n: (0, 0, 0)),
        ],
        out_specs=[
            pl.BlockSpec((1, OHW, Cout), lambda n: (n, 0, 0)),
            pl.BlockSpec((1, 2, Cout), lambda n: (n, 0, 0)),
        ],
        out_shape=(
            jax.ShapeDtypeStruct((N, OHW, Cout), jnp.float32),    # y2 raw (pre-BN2)
            jax.ShapeDtypeStruct((N, 2, Cout), jnp.float32),      # BN2 partial stats
        ),
        scratch_shapes=[pltpu.VMEM((OH + 2, OW + 2, Cout), jnp.float32)],
        compiler_params=_COMPILER_PARAMS,
    )(y1, sc1, bi1, w2)

    sc2, bi2 = _bn_fold(s2, M, params["g2"], params["be2"])

    # ---- finalize: apply BN2 / BN_ds affines and add the two branches ---------------
    out = pl.pallas_call(
        _finalize_kernel,
        grid=(N,),
        in_specs=[
            pl.BlockSpec((1, OHW, Cout), lambda n: (n, 0, 0)),
            pl.BlockSpec((1, OHW, Cout), lambda n: (n, 0, 0)),
            pl.BlockSpec((1, Cout), lambda n: (0, 0)),
            pl.BlockSpec((1, Cout), lambda n: (0, 0)),
            pl.BlockSpec((1, Cout), lambda n: (0, 0)),
            pl.BlockSpec((1, Cout), lambda n: (0, 0)),
        ],
        out_specs=pl.BlockSpec((1, OHW, Cout), lambda n: (n, 0, 0)),
        out_shape=jax.ShapeDtypeStruct((N, OHW, Cout), jnp.float32),
        compiler_params=_COMPILER_PARAMS,
    )(y2, yd, sc2, bi2, scd, bid)

    out = out.reshape(N, OH, OW, Cout)
    return jnp.transpose(out, (0, 3, 1, 2))                            # back to NCHW


# -----------------------------------------------------------------------------
# Pure-JAX reference (f32, HIGHEST precision) for validation
# -----------------------------------------------------------------------------
def resblock_reference(x_nchw, params):
    x = jnp.transpose(x_nchw, (0, 2, 3, 1)).astype(jnp.float32)
    dn = ("NHWC", "HWIO", "NHWC")

    def conv(a, w, s, p):
        return jax.lax.conv_general_dilated(a, w, (s, s), [(p, p), (p, p)],
                                            dimension_numbers=dn,
                                            precision=jax.lax.Precision.HIGHEST)

    def bn(y, g, b):
        m = jnp.mean(y, axis=(0, 1, 2), keepdims=True)
        v = jnp.mean(jnp.square(y - m), axis=(0, 1, 2), keepdims=True)
        return (y - m) / jnp.sqrt(v + EPS) * g + b

    h = jax.nn.relu(conv(x, params["w1"], 2, 1) + params["b1"])
    h = bn(h, params["g1"], params["be1"])
    h = conv(h, params["w2"], 1, 1) + params["b2"]
    h = bn(h, params["g2"], params["be2"])
    d = bn(conv(x, params["wd"], 2, 0), params["gd"], params["bed"])
    return jnp.transpose(h + d, (0, 3, 1, 2))


# -----------------------------------------------------------------------------
# Deterministic parameter init (shapes from the module __init__; HWIO conv weights)
# -----------------------------------------------------------------------------
def init_params(key, cin, cout):
    ks = jax.random.split(key, 12)

    def u(k, shape, fan_in):
        b = 1.0 / np.sqrt(fan_in)
        return jax.random.uniform(k, shape, jnp.float32, -b, b)

    return {
        "w1": u(ks[0], (3, 3, cin, cout), 9 * cin),
        "b1": u(ks[1], (cout,), 9 * cin),
        "g1": 1.0 + 0.1 * jax.random.normal(ks[2], (cout,), jnp.float32),
        "be1": 0.1 * jax.random.normal(ks[3], (cout,), jnp.float32),
        "w2": u(ks[4], (3, 3, cout, cout), 9 * cout),
        "b2": u(ks[5], (cout,), 9 * cout),
        "g2": 1.0 + 0.1 * jax.random.normal(ks[6], (cout,), jnp.float32),
        "be2": 0.1 * jax.random.normal(ks[7], (cout,), jnp.float32),
        "wd": u(ks[8], (1, 1, cin, cout), cin),              # downsample conv, bias=False
        "gd": 1.0 + 0.1 * jax.random.normal(ks[9], (cout,), jnp.float32),
        "bed": 0.1 * jax.random.normal(ks[10], (cout,), jnp.float32),
    }


if __name__ == "__main__":
    N, Cin, Cout, H, W = 2, 4, 8, 16, 16
    kx, kp = jax.random.split(jax.random.PRNGKey(0))
    x = jax.random.normal(kx, (N, Cin, H, W), jnp.float32)
    params = init_params(kp, Cin, Cout)

    out = jax.jit(resblock_forward)(x, params)
    out = jax.block_until_ready(out)

    assert out.shape == (N, Cout, H // 2, W // 2), out.shape
    ref = resblock_reference(x, params)
    # bf16 MXU operands / bf16 inter-stage activation vs. an f32 HIGHEST-precision
    # reference -> slightly wider tolerance than a pure-f32 comparison.
    np.testing.assert_allclose(np.asarray(out), np.asarray(ref), atol=3e-2, rtol=3e-2)

    print("KERNEL_OK")
</pallas_src>

<mosaic_0001>
module attributes {stable_mosaic.version = 11 : i64} {
  func.func @kernel(%arg0: i32, %arg1: memref<1x64x8xbf16, #tpu.memory_space<vmem>>, %arg2: memref<1x8xf32, #tpu.memory_space<vmem>>, %arg3: memref<1x8xf32, #tpu.memory_space<vmem>>, %arg4: memref<9x8x8xbf16, #tpu.memory_space<vmem>>, %arg5: memref<1x64x8xf32, #tpu.memory_space<vmem>>, %arg6: memref<1x2x8xf32, #tpu.memory_space<vmem>>, %arg7: memref<10x10x8xf32, #tpu.memory_space<vmem>>) attributes {dimension_semantics = [#tpu.dimension_semantics<parallel>], iteration_bounds = array<i64: 2>, scalar_prefetch = 0 : i64, scratch_operands = 1 : i64, tpu.core_type = #tpu.core_type<tc>, window_params = [{transform_indices = @transform_0, window_bounds = array<i64: 1, 64, 8>}, {pipeline_mode = #tpu.pipeline_mode<synchronous>, transform_indices = @transform_1, window_bounds = array<i64: 1, 8>}, {pipeline_mode = #tpu.pipeline_mode<synchronous>, transform_indices = @transform_2, window_bounds = array<i64: 1, 8>}, {pipeline_mode = #tpu.pipeline_mode<synchronous>, transform_indices = @transform_3, window_bounds = array<i64: 9, 8, 8>}, {transform_indices = @transform_4, window_bounds = array<i64: 1, 64, 8>}, {transform_indices = @transform_5, window_bounds = array<i64: 1, 2, 8>}]} {
    %cst = arith.constant 0.000000e+00 : f32
    %0 = vector.broadcast %cst : f32 to vector<10x10x8xf32>
    %c0 = arith.constant 0 : index
    %c0_0 = arith.constant 0 : index
    %c0_1 = arith.constant 0 : index
    %1 = vector.load %arg7[%c0, %c0_0, %c0_1] : memref<10x10x8xf32, #tpu.memory_space<vmem>>, vector<10x10x8xf32>
    tpu.vector_store %arg7[%c0, %c0_0, %c0_1], %0 {strides = array<i32>} : memref<10x10x8xf32, #tpu.memory_space<vmem>>, vector<10x10x8xf32>,
    %c0_2 = arith.constant 0 : index
    %c0_3 = arith.constant 0 : index
    %c0_4 = arith.constant 0 : index
    %2 = vector.load %arg1[%c0_2, %c0_3, %c0_4] : memref<1x64x8xbf16, #tpu.memory_space<vmem>>, vector<1x64x8xbf16>
    %3 = vector.shape_cast %2 : vector<1x64x8xbf16> to vector<64x8xbf16>
    %4 = arith.extf %3 : vector<64x8xbf16> to vector<64x8xf32>
    %c0_5 = arith.constant 0 : index
    %c0_6 = arith.constant 0 : index
    %5 = vector.load %arg2[%c0_5, %c0_6] : memref<1x8xf32, #tpu.memory_space<vmem>>, vector<1x8xf32>
    %6 = vector.broadcast %5 : vector<1x8xf32> to vector<64x8xf32>
    %7 = arith.mulf %4, %6 : vector<64x8xf32>
    %c0_7 = arith.constant 0 : index
    %c0_8 = arith.constant 0 : index
    %8 = vector.load %arg3[%c0_7, %c0_8] : memref<1x8xf32, #tpu.memory_space<vmem>>, vector<1x8xf32>
    %9 = vector.broadcast %8 : vector<1x8xf32> to vector<64x8xf32>
    %10 = arith.addf %7, %9 : vector<64x8xf32>
    %11 = vector.shape_cast %10 : vector<64x8xf32> to vector<8x8x8xf32>
    %c1 = arith.constant 1 : index
    %c1_9 = arith.constant 1 : index
    %c0_10 = arith.constant 0 : index
    %12 = vector.load %arg7[%c1, %c1_9, %c0_10] : memref<10x10x8xf32, #tpu.memory_space<vmem>>, vector<8x8x8xf32>
    tpu.vector_store %arg7[%c1, %c1_9, %c0_10], %11 {strides = array<i32>} : memref<10x10x8xf32, #tpu.memory_space<vmem>>, vector<8x8x8xf32>,
    %cst_11 = arith.constant 0.000000e+00 : f32
    %13 = vector.broadcast %cst_11 : f32 to vector<64x8xf32>
    %c0_12 = arith.constant 0 : index
    %c0_13 = arith.constant 0 : index
    %c0_14 = arith.constant 0 : index
    %14 = vector.load %arg7[%c0_12, %c0_13, %c0_14] : memref<10x10x8xf32, #tpu.memory_space<vmem>>, vector<8x8x8xf32>
    %15 = vector.shape_cast %14 : vector<8x8x8xf32> to vector<64x8xf32>
    %16 = arith.truncf %15 : vector<64x8xf32> to vector<64x8xbf16>
    %c0_15 = arith.constant 0 : index
    %c0_16 = arith.constant 0 : index
    %c0_17 = arith.constant 0 : index
    %17 = vector.load %arg4[%c0_15, %c0_16, %c0_17] : memref<9x8x8xbf16, #tpu.memory_space<vmem>>, vector<1x8x8xbf16>
    %18 = vector.shape_cast %17 : vector<1x8x8xbf16> to vector<8x8xbf16>
    %cst_18 = arith.constant dense<0.000000e+00> : vector<64x8xf32>
    %19 = tpu.matmul %16, %18, %cst_18 {dimension_numbers = #tpu.dot_dimension_numbers<[1], [0], [0], [1], [0, 0, 1, 1], [], []>} : vector<64x8xbf16>, vector<8x8xbf16>, vector<64x8xf32> -> vector<64x8xf32>
    %20 = arith.addf %13, %19 : vector<64x8xf32>
    %c0_19 = arith.constant 0 : index
    %c1_20 = arith.constant 1 : index
    %c0_21 = arith.constant 0 : index
    %21 = vector.load %arg7[%c0_19, %c1_20, %c0_21] : memref<10x10x8xf32, #tpu.memory_space<vmem>>, vector<8x8x8xf32>
    %22 = vector.shape_cast %21 : vector<8x8x8xf32> to vector<64x8xf32>
    %23 = arith.truncf %22 : vector<64x8xf32> to vector<64x8xbf16>
    %c1_22 = arith.constant 1 : index
    %c0_23 = arith.constant 0 : index
    %c0_24 = arith.constant 0 : index
    %24 = vector.load %arg4[%c1_22, %c0_23, %c0_24] : memref<9x8x8xbf16, #tpu.memory_space<vmem>>, vector<1x8x8xbf16>
    %25 = vector.shape_cast %24 : vector<1x8x8xbf16> to vector<8x8xbf16>
    %cst_25 = arith.constant dense<0.000000e+00> : vector<64x8xf32>
    %26 = tpu.matmul %23, %25, %cst_25 {dimension_numbers = #tpu.dot_dimension_numbers<[1], [0], [0], [1], [0, 0, 1, 1], [], []>} : vector<64x8xbf16>, vector<8x8xbf16>, vector<64x8xf32> -> vector<64x8xf32>
    %27 = arith.addf %20, %26 : vector<64x8xf32>
    %c0_26 = arith.constant 0 : index
    %c2 = arith.constant 2 : index
    %c0_27 = arith.constant 0 : index
    %28 = vector.load %arg7[%c0_26, %c2, %c0_27] : memref<10x10x8xf32, #tpu.memory_space<vmem>>, vector<8x8x8xf32>
    %29 = vector.shape_cast %28 : vector<8x8x8xf32> to vector<64x8xf32>
    %30 = arith.truncf %29 : vector<64x8xf32> to vector<64x8xbf16>
    %c2_28 = arith.constant 2 : index
    %c0_29 = arith.constant 0 : index
    %c0_30 = arith.constant 0 : index
    %31 = vector.load %arg4[%c2_28, %c0_29, %c0_30] : memref<9x8x8xbf16, #tpu.memory_space<vmem>>, vector<1x8x8xbf16>
    %32 = vector.shape_cast %31 : vector<1x8x8xbf16> to vector<8x8xbf16>
    %cst_31 = arith.constant dense<0.000000e+00> : vector<64x8xf32>
    %33 = tpu.matmul %30, %32, %cst_31 {dimension_numbers = #tpu.dot_dimension_numbers<[1], [0], [0], [1], [0, 0, 1, 1], [], []>} : vector<64x8xbf16>, vector<8x8xbf16>, vector<64x8xf32> -> vector<64x8xf32>
    %34 = arith.addf %27, %33 : vector<64x8xf32>
    %c1_32 = arith.constant 1 : index
    %c0_33 = arith.constant 0 : index
    %c0_34 = arith.constant 0 : index
    %35 = vector.load %arg7[%c1_32, %c0_33, %c0_34] : memref<10x10x8xf32, #tpu.memory_space<vmem>>, vector<8x8x8xf32>
    %36 = vector.shape_cast %35 : vector<8x8x8xf32> to vector<64x8xf32>
    %37 = arith.truncf %36 : vector<64x8xf32> to vector<64x8xbf16>
    %c3 = arith.constant 3 : index
    %c0_35 = arith.constant 0 : index
    %c0_36 = arith.constant 0 : index
    %38 = vector.load %arg4[%c3, %c0_35, %c0_36] : memref<9x8x8xbf16, #tpu.memory_space<vmem>>, vector<1x8x8xbf16>
    %39 = vector.shape_cast %38 : vector<1x8x8xbf16> to vector<8x8xbf16>
    %cst_37 = arith.constant dense<0.000000e+00> : vector<64x8xf32>
    %40 = tpu.matmul %37, %39, %cst_37 {dimension_numbers = #tpu.dot_dimension_numbers<[1], [0], [0], [1], [0, 0, 1, 1], [], []>} : vector<64x8xbf16>, vector<8x8xbf16>, vector<64x8xf32> -> vector<64x8xf32>
    %41 = arith.addf %34, %40 : vector<64x8xf32>
    %c1_38 = arith.constant 1 : index
    %c1_39 = arith.constant 1 : index
    %c0_40 = arith.constant 0 : index
    %42 = vector.load %arg7[%c1_38, %c1_39, %c0_40] : memref<10x10x8xf32, #tpu.memory_space<vmem>>, vector<8x8x8xf32>
    %43 = vector.shape_cast %42 : vector<8x8x8xf32> to vector<64x8xf32>
    %44 = arith.truncf %43 : vector<64x8xf32> to vector<64x8xbf16>
    %c4 = arith.constant 4 : index
    %c0_41 = arith.constant 0 : index
    %c0_42 = arith.constant 0 : index
    %45 = vector.load %arg4[%c4, %c0_41, %c0_42] : memref<9x8x8xbf16, #tpu.memory_space<vmem>>, vector<1x8x8xbf16>
    %46 = vector.shape_cast %45 : vector<1x8x8xbf16> to vector<8x8xbf16>
    %cst_43 = arith.constant dense<0.000000e+00> : vector<64x8xf32>
    %47 = tpu.matmul %44, %46, %cst_43 {dimension_numbers = #tpu.dot_dimension_numbers<[1], [0], [0], [1], [0, 0, 1, 1], [], []>} : vector<64x8xbf16>, vector<8x8xbf16>, vector<64x8xf32> -> vector<64x8xf32>
    %48 = arith.addf %41, %47 : vector<64x8xf32>
    %c1_44 = arith.constant 1 : index
    %c2_45 = arith.constant 2 : index
    %c0_46 = arith.constant 0 : index
    %49 = vector.load %arg7[%c1_44, %c2_45, %c0_46] : memref<10x10x8xf32, #tpu.memory_space<vmem>>, vector<8x8x8xf32>
    %50 = vector.shape_cast %49 : vector<8x8x8xf32> to vector<64x8xf32>
    %51 = arith.truncf %50 : vector<64x8xf32> to vector<64x8xbf16>
    %c5 = arith.constant 5 : index
    %c0_47 = arith.constant 0 : index
    %c0_48 = arith.constant 0 : index
    %52 = vector.load %arg4[%c5, %c0_47, %c0_48] : memref<9x8x8xbf16, #tpu.memory_space<vmem>>, vector<1x8x8xbf16>
    %53 = vector.shape_cast %52 : vector<1x8x8xbf16> to vector<8x8xbf16>
    %cst_49 = arith.constant dense<0.000000e+00> : vector<64x8xf32>
    %54 = tpu.matmul %51, %53, %cst_49 {dimension_numbers = #tpu.dot_dimension_numbers<[1], [0], [0], [1], [0, 0, 1, 1], [], []>} : vector<64x8xbf16>, vector<8x8xbf16>, vector<64x8xf32> -> vector<64x8xf32>
    %55 = arith.addf %48, %54 : vector<64x8xf32>
    %c2_50 = arith.constant 2 : index
    %c0_51 = arith.constant 0 : index
    %c0_52 = arith.constant 0 : index
    %56 = vector.load %arg7[%c2_50, %c0_51, %c0_52] : memref<10x10x8xf32, #tpu.memory_space<vmem>>, vector<8x8x8xf32>
    %57 = vector.shape_cast %56 : vector<8x8x8xf32> to vector<64x8xf32>
    %58 = arith.truncf %57 : vector<64x8xf32> to vector<64x8xbf16>
    %c6 = arith.constant 6 : index
    %c0_53 = arith.constant 0 : index
    %c0_54 = arith.constant 0 : index
    %59 = vector.load %arg4[%c6, %c0_53, %c0_54] : memref<9x8x8xbf16, #tpu.memory_space<vmem>>, vector<1x8x8xbf16>
    %60 = vector.shape_cast %59 : vector<1x8x8xbf16> to vector<8x8xbf16>
    %cst_55 = arith.constant dense<0.000000e+00> : vector<64x8xf32>
    %61 = tpu.matmul %58, %60, %cst_55 {dimension_numbers = #tpu.dot_dimension_numbers<[1], [0], [0], [1], [0, 0, 1, 1], [], []>} : vector<64x8xbf16>, vector<8x8xbf16>, vector<64x8xf32> -> vector<64x8xf32>
    %62 = arith.addf %55, %61 : vector<64x8xf32>
    %c2_56 = arith.constant 2 : index
    %c1_57 = arith.constant 1 : index
    %c0_58 = arith.constant 0 : index
    %63 = vector.load %arg7[%c2_56, %c1_57, %c0_58] : memref<10x10x8xf32, #tpu.memory_space<vmem>>, vector<8x8x8xf32>
    %64 = vector.shape_cast %63 : vector<8x8x8xf32> to vector<64x8xf32>
    %65 = arith.truncf %64 : vector<64x8xf32> to vector<64x8xbf16>
    %c7 = arith.constant 7 : index
    %c0_59 = arith.constant 0 : index
    %c0_60 = arith.constant 0 : index
    %66 = vector.load %arg4[%c7, %c0_59, %c0_60] : memref<9x8x8xbf16, #tpu.memory_space<vmem>>, vector<1x8x8xbf16>
    %67 = vector.shape_cast %66 : vector<1x8x8xbf16> to vector<8x8xbf16>
    %cst_61 = arith.constant dense<0.000000e+00> : vector<64x8xf32>
    %68 = tpu.matmul %65, %67, %cst_61 {dimension_numbers = #tpu.dot_dimension_numbers<[1], [0], [0], [1], [0, 0, 1, 1], [], []>} : vector<64x8xbf16>, vector<8x8xbf16>, vector<64x8xf32> -> vector<64x8xf32>
    %69 = arith.addf %62, %68 : vector<64x8xf32>
    %c2_62 = arith.constant 2 : index
    %c2_63 = arith.constant 2 : index
    %c0_64 = arith.constant 0 : index
    %70 = vector.load %arg7[%c2_62, %c2_63, %c0_64] : memref<10x10x8xf32, #tpu.memory_space<vmem>>, vector<8x8x8xf32>
    %71 = vector.shape_cast %70 : vector<8x8x8xf32> to vector<64x8xf32>
    %72 = arith.truncf %71 : vector<64x8xf32> to vector<64x8xbf16>
    %c8 = arith.constant 8 : index
    %c0_65 = arith.constant 0 : index
    %c0_66 = arith.constant 0 : index
    %73 = vector.load %arg4[%c8, %c0_65, %c0_66] : memref<9x8x8xbf16, #tpu.memory_space<vmem>>, vector<1x8x8xbf16>
    %74 = vector.shape_cast %73 : vector<1x8x8xbf16> to vector<8x8xbf16>
    %cst_67 = arith.constant dense<0.000000e+00> : vector<64x8xf32>
    %75 = tpu.matmul %72, %74, %cst_67 {dimension_numbers = #tpu.dot_dimension_numbers<[1], [0], [0], [1], [0, 0, 1, 1], [], []>} : vector<64x8xbf16>, vector<8x8xbf16>, vector<64x8xf32> -> vector<64x8xf32>
    %76 = arith.addf %69, %75 : vector<64x8xf32>
    %c0_68 = arith.constant 0 : index
    %c0_69 = arith.constant 0 : index
    %c0_70 = arith.constant 0 : index
    %77 = vector.load %arg5[%c0_68, %c0_69, %c0_70] : memref<1x64x8xf32, #tpu.memory_space<vmem>>, vector<1x64x8xf32>
    %78 = vector.shape_cast %77 : vector<1x64x8xf32> to vector<64x8xf32>
    %79 = vector.shape_cast %76 : vector<64x8xf32> to vector<1x64x8xf32>
    tpu.vector_store %arg5[%c0_68, %c0_69, %c0_70], %79 {strides = array<i32>} : memref<1x64x8xf32, #tpu.memory_space<vmem>>, vector<1x64x8xf32>,
    %cst_71 = arith.constant dense<0.000000e+00> : vector<8xf32>
    %80 = vector.multi_reduction <add>, %76, %cst_71 [0] : vector<64x8xf32> to vector<8xf32>
    %81 = vector.shape_cast %80 : vector<8xf32> to vector<1x8xf32>
    %c0_72 = arith.constant 0 : index
    %c0_73 = arith.constant 0 : index
    %c0_74 = arith.constant 0 : index
    %82 = vector.load %arg6[%c0_72, %c0_73, %c0_74] : memref<1x2x8xf32, #tpu.memory_space<vmem>>, vector<1x1x8xf32>
    %83 = vector.shape_cast %82 : vector<1x1x8xf32> to vector<1x8xf32>
    %84 = vector.shape_cast %81 : vector<1x8xf32> to vector<1x1x8xf32>
    tpu.vector_store %arg6[%c0_72, %c0_73, %c0_74], %84 {strides = array<i32>} : memref<1x2x8xf32, #tpu.memory_space<vmem>>, vector<1x1x8xf32>,
    %85 = arith.mulf %76, %76 : vector<64x8xf32>
    %cst_75 = arith.constant dense<0.000000e+00> : vector<8xf32>
    %86 = vector.multi_reduction <add>, %85, %cst_75 [0] : vector<64x8xf32> to vector<8xf32>
    %87 = vector.shape_cast %86 : vector<8xf32> to vector<1x8xf32>
    %c0_76 = arith.constant 0 : index
    %c1_77 = arith.constant 1 : index
    %c0_78 = arith.constant 0 : index
    %88 = vector.load %arg6[%c0_76, %c1_77, %c0_78] : memref<1x2x8xf32, #tpu.memory_space<vmem>>, vector<1x1x8xf32>
    %89 = vector.shape_cast %88 : vector<1x1x8xf32> to vector<1x8xf32>
    %90 = vector.shape_cast %87 : vector<1x8xf32> to vector<1x1x8xf32>
    tpu.vector_store %arg6[%c0_76, %c1_77, %c0_78], %90 {strides = array<i32>} : memref<1x2x8xf32, #tpu.memory_space<vmem>>, vector<1x1x8xf32>,
    return
  }
  func.func @transform_0(%arg0: i32) -> (i32, i32, i32) {
    %c0_i32 = arith.constant 0 : i32
    %c0_i32_0 = arith.constant 0 : i32
    %c0_i32_1 = arith.constant 0 : i32
    return %arg0, %c0_i32, %c0_i32_0 : i32, i32, i32
  }
  func.func @transform_1(%arg0: i32) -> (i32, i32) {
    %c0_i32 = arith.constant 0 : i32
    %c0_i32_0 = arith.constant 0 : i32
    %c0_i32_1 = arith.constant 0 : i32
    return %c0_i32, %c0_i32_0 : i32, i32
  }
  func.func @transform_2(%arg0: i32) -> (i32, i32) {
    %c0_i32 = arith.constant 0 : i32
    %c0_i32_0 = arith.constant 0 : i32
    %c0_i32_1 = arith.constant 0 : i32
    return %c0_i32, %c0_i32_0 : i32, i32
  }
  func.func @transform_3(%arg0: i32) -> (i32, i32, i32) {
    %c0_i32 = arith.constant 0 : i32
    %c0_i32_0 = arith.constant 0 : i32
    %c0_i32_1 = arith.constant 0 : i32
    %c0_i32_2 = arith.constant 0 : i32
    return %c0_i32, %c0_i32_0, %c0_i32_1 : i32, i32, i32
  }
  func.func @transform_4(%arg0: i32) -> (i32, i32, i32) {
    %c0_i32 = arith.constant 0 : i32
    %c0_i32_0 = arith.constant 0 : i32
    %c0_i32_1 = arith.constant 0 : i32
    return %arg0, %c0_i32, %c0_i32_0 : i32, i32, i32
  }
  func.func @transform_5(%arg0: i32) -> (i32, i32, i32) {
    %c0_i32 = arith.constant 0 : i32
    %c0_i32_0 = arith.constant 0 : i32
    %c0_i32_1 = arith.constant 0 : i32
    return %arg0, %c0_i32, %c0_i32_0 : i32, i32, i32
  }
}

module attributes {stable_mosaic.version = 11 : i64} {
  func.func @kernel(%arg0: i32, %arg1: memref<1x36x9x4xf32, #tpu.memory_space<vmem>>, %arg2: memref<9x4x8xbf16, #tpu.memory_space<vmem>>, %arg3: memref<1x8xf32, #tpu.memory_space<vmem>>, %arg4: memref<4x8xbf16, #tpu.memory_space<vmem>>, %arg5: memref<1x64x8xbf16, #tpu.memory_space<vmem>>, %arg6: memref<1x64x8xf32, #tpu.memory_space<vmem>>, %arg7: memref<1x2x8xf32, #tpu.memory_space<vmem>>, %arg8: memref<1x2x8xf32, #tpu.memory_space<vmem>>) attributes {dimension_semantics = [#tpu.dimension_semantics<parallel>], iteration_bounds = array<i64: 2>, scalar_prefetch = 0 : i64, scratch_operands = 0 : i64, tpu.core_type = #tpu.core_type<tc>, window_params = [{transform_indices = @transform_0, window_bounds = array<i64: 1, 36, 9, 4>}, {pipeline_mode = #tpu.pipeline_mode<synchronous>, transform_indices = @transform_1, window_bounds = array<i64: 9, 4, 8>}, {pipeline_mode = #tpu.pipeline_mode<synchronous>, transform_indices = @transform_2, window_bounds = array<i64: 1, 8>}, {pipeline_mode = #tpu.pipeline_mode<synchronous>, transform_indices = @transform_3, window_bounds = array<i64: 4, 8>}, {transform_indices = @transform_4, window_bounds = array<i64: 1, 64, 8>}, {transform_indices = @transform_5, window_bounds = array<i64: 1, 64, 8>}, {transform_indices = @transform_6, window_bounds = array<i64: 1, 2, 8>}, {transform_indices = @transform_7, window_bounds = array<i64: 1, 2, 8>}]} {
    %cst = arith.constant 0.000000e+00 : f32
    %0 = vector.broadcast %cst : f32 to vector<64x8xf32>
    %c0 = arith.constant 0 : index
    %c0_0 = arith.constant 0 : index
    %c0_1 = arith.constant 0 : index
    %c0_2 = arith.constant 0 : index
    %1 = vector.load %arg1[%c0, %c0_0, %c0_1, %c0_2] : memref<1x36x9x4xf32, #tpu.memory_space<vmem>>, vector<1x8x8x4xf32>
    %2 = vector.shape_cast %1 : vector<1x8x8x4xf32> to vector<8x8x4xf32>
    %3 = vector.shape_cast %2 : vector<8x8x4xf32> to vector<64x4xf32>
    %4 = arith.truncf %3 : vector<64x4xf32> to vector<64x4xbf16>
    %c0_3 = arith.constant 0 : index
    %c0_4 = arith.constant 0 : index
    %c0_5 = arith.constant 0 : index
    %5 = vector.load %arg2[%c0_3, %c0_4, %c0_5] : memref<9x4x8xbf16, #tpu.memory_space<vmem>>, vector<1x4x8xbf16>
    %6 = vector.shape_cast %5 : vector<1x4x8xbf16> to vector<4x8xbf16>
    %cst_6 = arith.constant dense<0.000000e+00> : vector<64x8xf32>
    %7 = tpu.matmul %4, %6, %cst_6 {dimension_numbers = #tpu.dot_dimension_numbers<[1], [0], [0], [1], [0, 0, 1, 1], [], []>} : vector<64x4xbf16>, vector<4x8xbf16>, vector<64x8xf32> -> vector<64x8xf32>
    %8 = arith.addf %0, %7 : vector<64x8xf32>
    %c0_7 = arith.constant 0 : index
    %c9 = arith.constant 9 : index
    %c0_8 = arith.constant 0 : index
    %c0_9 = arith.constant 0 : index
    %9 = vector.load %arg1[%c0_7, %c9, %c0_8, %c0_9] : memref<1x36x9x4xf32, #tpu.memory_space<vmem>>, vector<1x8x8x4xf32>
    %10 = vector.shape_cast %9 : vector<1x8x8x4xf32> to vector<8x8x4xf32>
    %11 = vector.shape_cast %10 : vector<8x8x4xf32> to vector<64x4xf32>
    %12 = arith.truncf %11 : vector<64x4xf32> to vector<64x4xbf16>
    %c1 = arith.constant 1 : index
    %c0_10 = arith.constant 0 : index
    %c0_11 = arith.constant 0 : index
    %13 = vector.load %arg2[%c1, %c0_10, %c0_11] : memref<9x4x8xbf16, #tpu.memory_space<vmem>>, vector<1x4x8xbf16>
    %14 = vector.shape_cast %13 : vector<1x4x8xbf16> to vector<4x8xbf16>
    %cst_12 = arith.constant dense<0.000000e+00> : vector<64x8xf32>
    %15 = tpu.matmul %12, %14, %cst_12 {dimension_numbers = #tpu.dot_dimension_numbers<[1], [0], [0], [1], [0, 0, 1, 1], [], []>} : vector<64x4xbf16>, vector<4x8xbf16>, vector<64x8xf32> -> vector<64x8xf32>
    %16 = arith.addf %8, %15 : vector<64x8xf32>
    %c0_13 = arith.constant 0 : index
    %c0_14 = arith.constant 0 : index
    %c1_15 = arith.constant 1 : index
    %c0_16 = arith.constant 0 : index
    %17 = vector.load %arg1[%c0_13, %c0_14, %c1_15, %c0_16] : memref<1x36x9x4xf32, #tpu.memory_space<vmem>>, vector<1x8x8x4xf32>
    %18 = vector.shape_cast %17 : vector<1x8x8x4xf32> to vector<8x8x4xf32>
    %19 = vector.shape_cast %18 : vector<8x8x4xf32> to vector<64x4xf32>
    %20 = arith.truncf %19 : vector<64x4xf32> to vector<64x4xbf16>
    %c2 = arith.constant 2 : index
    %c0_17 = arith.constant 0 : index
    %c0_18 = arith.constant 0 : index
    %21 = vector.load %arg2[%c2, %c0_17, %c0_18] : memref<9x4x8xbf16, #tpu.memory_space<vmem>>, vector<1x4x8xbf16>
    %22 = vector.shape_cast %21 : vector<1x4x8xbf16> to vector<4x8xbf16>
    %cst_19 = arith.constant dense<0.000000e+00> : vector<64x8xf32>
    %23 = tpu.matmul %20, %22, %cst_19 {dimension_numbers = #tpu.dot_dimension_numbers<[1], [0], [0], [1], [0, 0, 1, 1], [], []>} : vector<64x4xbf16>, vector<4x8xbf16>, vector<64x8xf32> -> vector<64x8xf32>
    %24 = arith.addf %16, %23 : vector<64x8xf32>
    %c0_20 = arith.constant 0 : index
    %c18 = arith.constant 18 : index
    %c0_21 = arith.constant 0 : index
    %c0_22 = arith.constant 0 : index
    %25 = vector.load %arg1[%c0_20, %c18, %c0_21, %c0_22] : memref<1x36x9x4xf32, #tpu.memory_space<vmem>>, vector<1x8x8x4xf32>
    %26 = vector.shape_cast %25 : vector<1x8x8x4xf32> to vector<8x8x4xf32>
    %27 = vector.shape_cast %26 : vector<8x8x4xf32> to vector<64x4xf32>
    %28 = arith.truncf %27 : vector<64x4xf32> to vector<64x4xbf16>
    %c3 = arith.constant 3 : index
    %c0_23 = arith.constant 0 : index
    %c0_24 = arith.constant 0 : index
    %29 = vector.load %arg2[%c3, %c0_23, %c0_24] : memref<9x4x8xbf16, #tpu.memory_space<vmem>>, vector<1x4x8xbf16>
    %30 = vector.shape_cast %29 : vector<1x4x8xbf16> to vector<4x8xbf16>
    %cst_25 = arith.constant dense<0.000000e+00> : vector<64x8xf32>
    %31 = tpu.matmul %28, %30, %cst_25 {dimension_numbers = #tpu.dot_dimension_numbers<[1], [0], [0], [1], [0, 0, 1, 1], [], []>} : vector<64x4xbf16>, vector<4x8xbf16>, vector<64x8xf32> -> vector<64x8xf32>
    %32 = arith.addf %24, %31 : vector<64x8xf32>
    %c0_26 = arith.constant 0 : index
    %c27 = arith.constant 27 : index
    %c0_27 = arith.constant 0 : index
    %c0_28 = arith.constant 0 : index
    %33 = vector.load %arg1[%c0_26, %c27, %c0_27, %c0_28] : memref<1x36x9x4xf32, #tpu.memory_space<vmem>>, vector<1x8x8x4xf32>
    %34 = vector.shape_cast %33 : vector<1x8x8x4xf32> to vector<8x8x4xf32>
    %35 = vector.shape_cast %34 : vector<8x8x4xf32> to vector<64x4xf32>
    %36 = arith.truncf %35 : vector<64x4xf32> to vector<64x4xbf16>
    %c4 = arith.constant 4 : index
    %c0_29 = arith.constant 0 : index
    %c0_30 = arith.constant 0 : index
    %37 = vector.load %arg2[%c4, %c0_29, %c0_30] : memref<9x4x8xbf16, #tpu.memory_space<vmem>>, vector<1x4x8xbf16>
    %38 = vector.shape_cast %37 : vector<1x4x8xbf16> to vector<4x8xbf16>
    %cst_31 = arith.constant dense<0.000000e+00> : vector<64x8xf32>
    %39 = tpu.matmul %36, %38, %cst_31 {dimension_numbers = #tpu.dot_dimension_numbers<[1], [0], [0], [1], [0, 0, 1, 1], [], []>} : vector<64x4xbf16>, vector<4x8xbf16>, vector<64x8xf32> -> vector<64x8xf32>
    %40 = arith.addf %32, %39 : vector<64x8xf32>
    %c0_32 = arith.constant 0 : index
    %c18_33 = arith.constant 18 : index
    %c1_34 = arith.constant 1 : index
    %c0_35 = arith.constant 0 : index
    %41 = vector.load %arg1[%c0_32, %c18_33, %c1_34, %c0_35] : memref<1x36x9x4xf32, #tpu.memory_space<vmem>>, vector<1x8x8x4xf32>
    %42 = vector.shape_cast %41 : vector<1x8x8x4xf32> to vector<8x8x4xf32>
    %43 = vector.shape_cast %42 : vector<8x8x4xf32> to vector<64x4xf32>
    %44 = arith.truncf %43 : vector<64x4xf32> to vector<64x4xbf16>
    %c5 = arith.constant 5 : index
    %c0_36 = arith.constant 0 : index
    %c0_37 = arith.constant 0 : index
    %45 = vector.load %arg2[%c5, %c0_36, %c0_37] : memref<9x4x8xbf16, #tpu.memory_space<vmem>>, vector<1x4x8xbf16>
    %46 = vector.shape_cast %45 : vector<1x4x8xbf16> to vector<4x8xbf16>
    %cst_38 = arith.constant dense<0.000000e+00> : vector<64x8xf32>
    %47 = tpu.matmul %44, %46, %cst_38 {dimension_numbers = #tpu.dot_dimension_numbers<[1], [0], [0], [1], [0, 0, 1, 1], [], []>} : vector<64x4xbf16>, vector<4x8xbf16>, vector<64x8xf32> -> vector<64x8xf32>
    %48 = arith.addf %40, %47 : vector<64x8xf32>
    %c0_39 = arith.constant 0 : index
    %c1_40 = arith.constant 1 : index
    %c0_41 = arith.constant 0 : index
    %c0_42 = arith.constant 0 : index
    %49 = vector.load %arg1[%c0_39, %c1_40, %c0_41, %c0_42] : memref<1x36x9x4xf32, #tpu.memory_space<vmem>>, vector<1x8x8x4xf32>
    %50 = vector.shape_cast %49 : vector<1x8x8x4xf32> to vector<8x8x4xf32>
    %51 = vector.shape_cast %50 : vector<8x8x4xf32> to vector<64x4xf32>
    %52 = arith.truncf %51 : vector<64x4xf32> to vector<64x4xbf16>
    %c6 = arith.constant 6 : index
    %c0_43 = arith.constant 0 : index
    %c0_44 = arith.constant 0 : index
    %53 = vector.load %arg2[%c6, %c0_43, %c0_44] : memref<9x4x8xbf16, #tpu.memory_space<vmem>>, vector<1x4x8xbf16>
    %54 = vector.shape_cast %53 : vector<1x4x8xbf16> to vector<4x8xbf16>
    %cst_45 = arith.constant dense<0.000000e+00> : vector<64x8xf32>
    %55 = tpu.matmul %52, %54, %cst_45 {dimension_numbers = #tpu.dot_dimension_numbers<[1], [0], [0], [1], [0, 0, 1, 1], [], []>} : vector<64x4xbf16>, vector<4x8xbf16>, vector<64x8xf32> -> vector<64x8xf32>
    %56 = arith.addf %48, %55 : vector<64x8xf32>
    %c0_46 = arith.constant 0 : index
    %c10 = arith.constant 10 : index
    %c0_47 = arith.constant 0 : index
    %c0_48 = arith.constant 0 : index
    %57 = vector.load %arg1[%c0_46, %c10, %c0_47, %c0_48] : memref<1x36x9x4xf32, #tpu.memory_space<vmem>>, vector<1x8x8x4xf32>
    %58 = vector.shape_cast %57 : vector<1x8x8x4xf32> to vector<8x8x4xf32>
    %59 = vector.shape_cast %58 : vector<8x8x4xf32> to vector<64x4xf32>
    %60 = arith.truncf %59 : vector<64x4xf32> to vector<64x4xbf16>
    %c7 = arith.constant 7 : index
    %c0_49 = arith.constant 0 : index
    %c0_50 = arith.constant 0 : index
    %61 = vector.load %arg2[%c7, %c0_49, %c0_50] : memref<9x4x8xbf16, #tpu.memory_space<vmem>>, vector<1x4x8xbf16>
    %62 = vector.shape_cast %61 : vector<1x4x8xbf16> to vector<4x8xbf16>
    %cst_51 = arith.constant dense<0.000000e+00> : vector<64x8xf32>
    %63 = tpu.matmul %60, %62, %cst_51 {dimension_numbers = #tpu.dot_dimension_numbers<[1], [0], [0], [1], [0, 0, 1, 1], [], []>} : vector<64x4xbf16>, vector<4x8xbf16>, vector<64x8xf32> -> vector<64x8xf32>
    %64 = arith.addf %56, %63 : vector<64x8xf32>
    %c0_52 = arith.constant 0 : index
    %c1_53 = arith.constant 1 : index
    %c1_54 = arith.constant 1 : index
    %c0_55 = arith.constant 0 : index
    %65 = vector.load %arg1[%c0_52, %c1_53, %c1_54, %c0_55] : memref<1x36x9x4xf32, #tpu.memory_space<vmem>>, vector<1x8x8x4xf32>
    %66 = vector.shape_cast %65 : vector<1x8x8x4xf32> to vector<8x8x4xf32>
    %67 = vector.shape_cast %66 : vector<8x8x4xf32> to vector<64x4xf32>
    %68 = arith.truncf %67 : vector<64x4xf32> to vector<64x4xbf16>
    %c8 = arith.constant 8 : index
    %c0_56 = arith.constant 0 : index
    %c0_57 = arith.constant 0 : index
    %69 = vector.load %arg2[%c8, %c0_56, %c0_57] : memref<9x4x8xbf16, #tpu.memory_space<vmem>>, vector<1x4x8xbf16>
    %70 = vector.shape_cast %69 : vector<1x4x8xbf16> to vector<4x8xbf16>
    %cst_58 = arith.constant dense<0.000000e+00> : vector<64x8xf32>
    %71 = tpu.matmul %68, %70, %cst_58 {dimension_numbers = #tpu.dot_dimension_numbers<[1], [0], [0], [1], [0, 0, 1, 1], [], []>} : vector<64x4xbf16>, vector<4x8xbf16>, vector<64x8xf32> -> vector<64x8xf32>
    %72 = arith.addf %64, %71 : vector<64x8xf32>
    %c0_59 = arith.constant 0 : index
    %c0_60 = arith.constant 0 : index
    %73 = vector.load %arg3[%c0_59, %c0_60] : memref<1x8xf32, #tpu.memory_space<vmem>>, vector<1x8xf32>
    %74 = vector.broadcast %73 : vector<1x8xf32> to vector<64x8xf32>
    %75 = arith.addf %72, %74 : vector<64x8xf32>
    %cst_61 = arith.constant 0.000000e+00 : f32
    %76 = vector.broadcast %cst_61 : f32 to vector<64x8xf32>
    %77 = arith.maximumf %75, %76 : vector<64x8xf32>
    %cst_62 = arith.constant dense<0.000000e+00> : vector<8xf32>
    %78 = vector.multi_reduction <add>, %77, %cst_62 [0] : vector<64x8xf32> to vector<8xf32>
    %79 = vector.shape_cast %78 : vector<8xf32> to vector<1x8xf32>
    %c0_63 = arith.constant 0 : index
    %c0_64 = arith.constant 0 : index
    %c0_65 = arith.constant 0 : index
    %80 = vector.load %arg7[%c0_63, %c0_64, %c0_65] : memref<1x2x8xf32, #tpu.memory_space<vmem>>, vector<1x1x8xf32>
    %81 = vector.shape_cast %80 : vector<1x1x8xf32> to vector<1x8xf32>
    %82 = vector.shape_cast %79 : vector<1x8xf32> to vector<1x1x8xf32>
    tpu.vector_store %arg7[%c0_63, %c0_64, %c0_65], %82 {strides = array<i32>} : memref<1x2x8xf32, #tpu.memory_space<vmem>>, vector<1x1x8xf32>,
    %83 = arith.mulf %77, %77 : vector<64x8xf32>
    %cst_66 = arith.constant dense<0.000000e+00> : vector<8xf32>
    %84 = vector.multi_reduction <add>, %83, %cst_66 [0] : vector<64x8xf32> to vector<8xf32>
    %85 = vector.shape_cast %84 : vector<8xf32> to vector<1x8xf32>
    %c0_67 = arith.constant 0 : index
    %c1_68 = arith.constant 1 : index
    %c0_69 = arith.constant 0 : index
    %86 = vector.load %arg7[%c0_67, %c1_68, %c0_69] : memref<1x2x8xf32, #tpu.memory_space<vmem>>, vector<1x1x8xf32>
    %87 = vector.shape_cast %86 : vector<1x1x8xf32> to vector<1x8xf32>
    %88 = vector.shape_cast %85 : vector<1x8xf32> to vector<1x1x8xf32>
    tpu.vector_store %arg7[%c0_67, %c1_68, %c0_69], %88 {strides = array<i32>} : memref<1x2x8xf32, #tpu.memory_space<vmem>>, vector<1x1x8xf32>,
    %89 = arith.truncf %77 : vector<64x8xf32> to vector<64x8xbf16>
    %c0_70 = arith.constant 0 : index
    %c0_71 = arith.constant 0 : index
    %c0_72 = arith.constant 0 : index
    %90 = vector.load %arg5[%c0_70, %c0_71, %c0_72] : memref<1x64x8xbf16, #tpu.memory_space<vmem>>, vector<1x64x8xbf16>
    %91 = vector.shape_cast %90 : vector<1x64x8xbf16> to vector<64x8xbf16>
    %92 = vector.shape_cast %89 : vector<64x8xbf16> to vector<1x64x8xbf16>
    tpu.vector_store %arg5[%c0_70, %c0_71, %c0_72], %92 {strides = array<i32>} : memref<1x64x8xbf16, #tpu.memory_space<vmem>>, vector<1x64x8xbf16>,
    %c0_73 = arith.constant 0 : index
    %c27_74 = arith.constant 27 : index
    %c0_75 = arith.constant 0 : index
    %c0_76 = arith.constant 0 : index
    %93 = vector.load %arg1[%c0_73, %c27_74, %c0_75, %c0_76] : memref<1x36x9x4xf32, #tpu.memory_space<vmem>>, vector<1x8x8x4xf32>
    %94 = vector.shape_cast %93 : vector<1x8x8x4xf32> to vector<8x8x4xf32>
    %95 = vector.shape_cast %94 : vector<8x8x4xf32> to vector<64x4xf32>
    %96 = arith.truncf %95 : vector<64x4xf32> to vector<64x4xbf16>
    %c0_77 = arith.constant 0 : index
    %c0_78 = arith.constant 0 : index
    %97 = vector.load %arg4[%c0_77, %c0_78] : memref<4x8xbf16, #tpu.memory_space<vmem>>, vector<4x8xbf16>
    %cst_79 = arith.constant dense<0.000000e+00> : vector<64x8xf32>
    %98 = tpu.matmul %96, %97, %cst_79 {dimension_numbers = #tpu.dot_dimension_numbers<[1], [0], [0], [1], [0, 0, 1, 1], [], []>} : vector<64x4xbf16>, vector<4x8xbf16>, vector<64x8xf32> -> vector<64x8xf32>
    %c0_80 = arith.constant 0 : index
    %c0_81 = arith.constant 0 : index
    %c0_82 = arith.constant 0 : index
    %99 = vector.load %arg6[%c0_80, %c0_81, %c0_82] : memref<1x64x8xf32, #tpu.memory_space<vmem>>, vector<1x64x8xf32>
    %100 = vector.shape_cast %99 : vector<1x64x8xf32> to vector<64x8xf32>
    %101 = vector.shape_cast %98 : vector<64x8xf32> to vector<1x64x8xf32>
    tpu.vector_store %arg6[%c0_80, %c0_81, %c0_82], %101 {strides = array<i32>} : memref<1x64x8xf32, #tpu.memory_space<vmem>>, vector<1x64x8xf32>,
    %cst_83 = arith.constant dense<0.000000e+00> : vector<8xf32>
    %102 = vector.multi_reduction <add>, %98, %cst_83 [0] : vector<64x8xf32> to vector<8xf32>
    %103 = vector.shape_cast %102 : vector<8xf32> to vector<1x8xf32>
    %c0_84 = arith.constant 0 : index
    %c0_85 = arith.constant 0 : index
    %c0_86 = arith.constant 0 : index
    %104 = vector.load %arg8[%c0_84, %c0_85, %c0_86] : memref<1x2x8xf32, #tpu.memory_space<vmem>>, vector<1x1x8xf32>
    %105 = vector.shape_cast %104 : vector<1x1x8xf32> to vector<1x8xf32>
    %106 = vector.shape_cast %103 : vector<1x8xf32> to vector<1x1x8xf32>
    tpu.vector_store %arg8[%c0_84, %c0_85, %c0_86], %106 {strides = array<i32>} : memref<1x2x8xf32, #tpu.memory_space<vmem>>, vector<1x1x8xf32>,
    %107 = arith.mulf %98, %98 : vector<64x8xf32>
    %cst_87 = arith.constant dense<0.000000e+00> : vector<8xf32>
    %108 = vector.multi_reduction <add>, %107, %cst_87 [0] : vector<64x8xf32> to vector<8xf32>
    %109 = vector.shape_cast %108 : vector<8xf32> to vector<1x8xf32>
    %c0_88 = arith.constant 0 : index
    %c1_89 = arith.constant 1 : index
    %c0_90 = arith.constant 0 : index
    %110 = vector.load %arg8[%c0_88, %c1_89, %c0_90] : memref<1x2x8xf32, #tpu.memory_space<vmem>>, vector<1x1x8xf32>
    %111 = vector.shape_cast %110 : vector<1x1x8xf32> to vector<1x8xf32>
    %112 = vector.shape_cast %109 : vector<1x8xf32> to vector<1x1x8xf32>
    tpu.vector_store %arg8[%c0_88, %c1_89, %c0_90], %112 {strides = array<i32>} : memref<1x2x8xf32, #tpu.memory_space<vmem>>, vector<1x1x8xf32>,
    return
  }
  func.func @transform_0(%arg0: i32) -> (i32, i32, i32, i32) {
    %c0_i32 = arith.constant 0 : i32
    %c0_i32_0 = arith.constant 0 : i32
    %c0_i32_1 = arith.constant 0 : i32
    %c0_i32_2 = arith.constant 0 : i32
    return %arg0, %c0_i32, %c0_i32_0, %c0_i32_1 : i32, i32, i32, i32
  }
  func.func @transform_1(%arg0: i32) -> (i32, i32, i32) {
    %c0_i32 = arith.constant 0 : i32
    %c0_i32_0 = arith.constant 0 : i32
    %c0_i32_1 = arith.constant 0 : i32
    %c0_i32_2 = arith.constant 0 : i32
    return %c0_i32, %c0_i32_0, %c0_i32_1 : i32, i32, i32
  }
  func.func @transform_2(%arg0: i32) -> (i32, i32) {
    %c0_i32 = arith.constant 0 : i32
    %c0_i32_0 = arith.constant 0 : i32
    %c0_i32_1 = arith.constant 0 : i32
    return %c0_i32, %c0_i32_0 : i32, i32
  }
  func.func @transform_3(%arg0: i32) -> (i32, i32) {
    %c0_i32 = arith.constant 0 : i32
    %c0_i32_0 = arith.constant 0 : i32
    %c0_i32_1 = arith.constant 0 : i32
    return %c0_i32, %c0_i32_0 : i32, i32
  }
  func.func @transform_4(%arg0: i32) -> (i32, i32, i32) {
    %c0_i32 = arith.constant 0 : i32
    %c0_i32_0 = arith.constant 0 : i32
    %c0_i32_1 = arith.constant 0 : i32
    return %arg0, %c0_i32, %c0_i32_0 : i32, i32, i32
  }
  func.func @transform_5(%arg0: i32) -> (i32, i32, i32) {
    %c0_i32 = arith.constant 0 : i32
    %c0_i32_0 = arith.constant 0 : i32
    %c0_i32_1 = arith.constant 0 : i32
    return %arg0, %c0_i32, %c0_i32_0 : i32, i32, i32
  }
  func.func @transform_6(%arg0: i32) -> (i32, i32, i32) {
    %c0_i32 = arith.constant 0 : i32
    %c0_i32_0 = arith.constant 0 : i32
    %c0_i32_1 = arith.constant 0 : i32
    return %arg0, %c0_i32, %c0_i32_0 : i32, i32, i32
  }
  func.func @transform_7(%arg0: i32) -> (i32, i32, i32) {
    %c0_i32 = arith.constant 0 : i32
    %c0_i32_0 = arith.constant 0 : i32
    %c0_i32_1 = arith.constant 0 : i32
    return %arg0, %c0_i32, %c0_i32_0 : i32, i32, i32
  }
}

module attributes {stable_mosaic.version = 11 : i64} {
  func.func @_finalize_kernel(%arg0: i32, %arg1: memref<1x64x8xf32, #tpu.memory_space<vmem>>, %arg2: memref<1x64x8xf32, #tpu.memory_space<vmem>>, %arg3: memref<1x8xf32, #tpu.memory_space<vmem>>, %arg4: memref<1x8xf32, #tpu.memory_space<vmem>>, %arg5: memref<1x8xf32, #tpu.memory_space<vmem>>, %arg6: memref<1x8xf32, #tpu.memory_space<vmem>>, %arg7: memref<1x64x8xf32, #tpu.memory_space<vmem>>) attributes {dimension_semantics = [#tpu.dimension_semantics<parallel>], iteration_bounds = array<i64: 2>, scalar_prefetch = 0 : i64, scratch_operands = 0 : i64, tpu.core_type = #tpu.core_type<tc>, window_params = [{transform_indices = @transform_0, window_bounds = array<i64: 1, 64, 8>}, {transform_indices = @transform_1, window_bounds = array<i64: 1, 64, 8>}, {pipeline_mode = #tpu.pipeline_mode<synchronous>, transform_indices = @transform_2, window_bounds = array<i64: 1, 8>}, {pipeline_mode = #tpu.pipeline_mode<synchronous>, transform_indices = @transform_3, window_bounds = array<i64: 1, 8>}, {pipeline_mode = #tpu.pipeline_mode<synchronous>, transform_indices = @transform_4, window_bounds = array<i64: 1, 8>}, {pipeline_mode = #tpu.pipeline_mode<synchronous>, transform_indices = @transform_5, window_bounds = array<i64: 1, 8>}, {transform_indices = @transform_6, window_bounds = array<i64: 1, 64, 8>}]} {
    %c0 = arith.constant 0 : index
    %c0_0 = arith.constant 0 : index
    %c0_1 = arith.constant 0 : index
    %0 = vector.load %arg1[%c0, %c0_0, %c0_1] : memref<1x64x8xf32, #tpu.memory_space<vmem>>, vector<1x64x8xf32>
    %1 = vector.shape_cast %0 : vector<1x64x8xf32> to vector<64x8xf32>
    %c0_2 = arith.constant 0 : index
    %c0_3 = arith.constant 0 : index
    %2 = vector.load %arg3[%c0_2, %c0_3] : memref<1x8xf32, #tpu.memory_space<vmem>>, vector<1x8xf32>
    %3 = vector.broadcast %2 : vector<1x8xf32> to vector<64x8xf32>
    %4 = arith.mulf %1, %3 : vector<64x8xf32>
    %c0_4 = arith.constant 0 : index
    %c0_5 = arith.constant 0 : index
    %5 = vector.load %arg4[%c0_4, %c0_5] : memref<1x8xf32, #tpu.memory_space<vmem>>, vector<1x8xf32>
    %6 = vector.broadcast %5 : vector<1x8xf32> to vector<64x8xf32>
    %7 = arith.addf %4, %6 : vector<64x8xf32>
    %c0_6 = arith.constant 0 : index
    %c0_7 = arith.constant 0 : index
    %c0_8 = arith.constant 0 : index
    %8 = vector.load %arg2[%c0_6, %c0_7, %c0_8] : memref<1x64x8xf32, #tpu.memory_space<vmem>>, vector<1x64x8xf32>
    %9 = vector.shape_cast %8 : vector<1x64x8xf32> to vector<64x8xf32>
    %c0_9 = arith.constant 0 : index
    %c0_10 = arith.constant 0 : index
    %10 = vector.load %arg5[%c0_9, %c0_10] : memref<1x8xf32, #tpu.memory_space<vmem>>, vector<1x8xf32>
    %11 = vector.broadcast %10 : vector<1x8xf32> to vector<64x8xf32>
    %12 = arith.mulf %9, %11 : vector<64x8xf32>
    %13 = arith.addf %7, %12 : vector<64x8xf32>
    %c0_11 = arith.constant 0 : index
    %c0_12 = arith.constant 0 : index
    %14 = vector.load %arg6[%c0_11, %c0_12] : memref<1x8xf32, #tpu.memory_space<vmem>>, vector<1x8xf32>
    %15 = vector.broadcast %14 : vector<1x8xf32> to vector<64x8xf32>
    %16 = arith.addf %13, %15 : vector<64x8xf32>
    %c0_13 = arith.constant 0 : index
    %c0_14 = arith.constant 0 : index
    %c0_15 = arith.constant 0 : index
    %17 = vector.load %arg7[%c0_13, %c0_14, %c0_15] : memref<1x64x8xf32, #tpu.memory_space<vmem>>, vector<1x64x8xf32>
    %18 = vector.shape_cast %17 : vector<1x64x8xf32> to vector<64x8xf32>
    %19 = vector.shape_cast %16 : vector<64x8xf32> to vector<1x64x8xf32>
    tpu.vector_store %arg7[%c0_13, %c0_14, %c0_15], %19 {strides = array<i32>} : memref<1x64x8xf32, #tpu.memory_space<vmem>>, vector<1x64x8xf32>,
    return
  }
  func.func @transform_0(%arg0: i32) -> (i32, i32, i32) {
    %c0_i32 = arith.constant 0 : i32
    %c0_i32_0 = arith.constant 0 : i32
    %c0_i32_1 = arith.constant 0 : i32
    return %arg0, %c0_i32, %c0_i32_0 : i32, i32, i32
  }
  func.func @transform_1(%arg0: i32) -> (i32, i32, i32) {
    %c0_i32 = arith.constant 0 : i32
    %c0_i32_0 = arith.constant 0 : i32
    %c0_i32_1 = arith.constant 0 : i32
    return %arg0, %c0_i32, %c0_i32_0 : i32, i32, i32
  }
  func.func @transform_2(%arg0: i32) -> (i32, i32) {
    %c0_i32 = arith.constant 0 : i32
    %c0_i32_0 = arith.constant 0 : i32
    %c0_i32_1 = arith.constant 0 : i32
    return %c0_i32, %c0_i32_0 : i32, i32
  }
  func.func @transform_3(%arg0: i32) -> (i32, i32) {
    %c0_i32 = arith.constant 0 : i32
    %c0_i32_0 = arith.constant 0 : i32
    %c0_i32_1 = arith.constant 0 : i32
    return %c0_i32, %c0_i32_0 : i32, i32
  }
  func.func @transform_4(%arg0: i32) -> (i32, i32) {
    %c0_i32 = arith.constant 0 : i32
    %c0_i32_0 = arith.constant 0 : i32
    %c0_i32_1 = arith.constant 0 : i32
    return %c0_i32, %c0_i32_0 : i32, i32
  }
  func.func @transform_5(%arg0: i32) -> (i32, i32) {
    %c0_i32 = arith.constant 0 : i32
    %c0_i32_0 = arith.constant 0 : i32
    %c0_i32_1 = arith.constant 0 : i32
    return %c0_i32, %c0_i32_0 : i32, i32
  }
  func.func @transform_6(%arg0: i32) -> (i32, i32, i32) {
    %c0_i32 = arith.constant 0 : i32
    %c0_i32_0 = arith.constant 0 : i32
    %c0_i32_1 = arith.constant 0 : i32
    return %arg0, %c0_i32, %c0_i32_0 : i32, i32, i32
  }
}

</mosaic_0001>

<bundles_post_ra>
// kernel: resblock_forward.5
= control target key start
LH: loop header
LB: loop body
LE: loop exit
PB: predicated region body
PF: predicated region fallthrough
CT: control target
= control target key end

     0   :  { %s503_s21 = smov 0   ;;  %s578_s0 = inlined_call_operand.vmem [shape: f32[2,64,8], index: 0, kind: input, shape index: {}]   ;;  %s579_s1 = inlined_call_operand.vmem [shape: f32[2,64,8], index: 1, kind: input, shape index: {}]   ;;  %s580_s2 = inlined_call_operand.vmem [shape: f32[1,8], index: 2, kind: input, shape index: {}]   ;;  %s581_s3 = inlined_call_operand.vmem [shape: f32[1,8], index: 3, kind: input, shape index: {}]   ;;  %s582_s4 = inlined_call_operand.vmem [shape: f32[1,8], index: 4, kind: input, shape index: {}]   ;;  %s583_s5 = inlined_call_operand.vmem [shape: f32[1,8], index: 5, kind: input, shape index: {}]   ;;  %s584_s6 = inlined_call_operand.vmem [shape: f32[2,64,8], index: 6, kind: output, shape index: {}]  }
   0x1 LB: > { %s432_s22 = sadd.s32 4294967295, %s466_s21   ;;  %p436_p0 = scmp.ge.s32.totalorder %s466_s21, 1  ;;  %s466_s21 = sphi %s503_s21, %s16_s21  }
   0x2   : > { %p222_p1 = scmp.lt.s32.totalorder %s466_s21, 3 }
   0x4   : > { %p223_p2 = pnand %p436_p0, %p222_p1 }
   0x5   : > { %p257_p3 = scmp.lt.s32.totalorder (!%p223_p2), %s432_s22, 1 }
   0x6   : > { %226 = sbr.rel (%p223_p2) target bundleno = 32 (0x20), region = 44 }
   0xb   : > { %s586_s22 = smov (!%p257_p3, %s432_s22), 1  ;;  %v443_v0 = vld [vmem:[%s580_s2] ss:$0 sm:$0xff]  ;;  %vm356_vm0 = vcmask 64512  }
   0xc   : > { %s511_s23 = sshll.u32 %s586_s22, 6  ;;  %v445_v1 = vld [vmem:[%s582_s4] ss:$0 sm:$0xff] }
   0xd   : > { %s523_s30 = scalar_lea.vmem %s578_s0, %s511_s23  ;;  %s529_s9 = scalar_lea.vmem %s579_s1, %s511_s23  ;;  %v444_v2 = vld [vmem:[%s581_s3] ss:$0 sm:$0xff] }
   0xe   : > { %v272_v3 = vld [vmem:[%s523_s30] sm:$0xff]  ;;  %v273_v5 = vld [vmem:[%s523_s30 + $0x8] sm:$0xff]  ;;  %v274_v10 = vld [vmem:[%s523_s30 + $0x10] sm:$0xff]  ;;  %s555_s16 = scalar_lea.vmem %s584_s6, %s511_s23 }
   0xf   : > { %v310_v4 = vld [vmem:[%s529_s9] sm:$0xff]  ;;  %v287_v6 = vmul.f32 %v443_v0, %v272_v3  ;;  %v288_v8 = vmul.f32 %v443_v0, %v273_v5  ;;  %v311_v9 = vld [vmem:[%s529_s9 + $0x8] sm:$0xff]  ;;  %v312_v11 = vld [vmem:[%s529_s9 + $0x10] sm:$0xff]  ;;  %v289_v13 = vmul.f32 %v443_v0, %v274_v10 }
  0x10   : > { %v325_v7 = vmul.f32 %v445_v1, %v310_v4  ;;  %v326_v12 = vmul.f32 %v445_v1, %v311_v9  ;;  %v327_v14 = vmul.f32 %v445_v1, %v312_v11  ;;  %v275_v15 = vld [vmem:[%s523_s30 + $0x18] sm:$0xff]  ;;  %v276_v17 = vld [vmem:[%s523_s30 + $0x20] sm:$0xff]  ;;  %v277_v23 = vld [vmem:[%s523_s30 + $0x28] sm:$0xff] }
  0x11   : > { %v313_v16 = vld [vmem:[%s529_s9 + $0x18] sm:$0xff]  ;;  %v302_v18 = vadd.f32 %v444_v2, %v287_v6  ;;  %v303_v19 = vadd.f32 %v444_v2, %v288_v8  ;;  %v290_v20 = vmul.f32 %v443_v0, %v275_v15  ;;  %v314_v22 = vld [vmem:[%s529_s9 + $0x20] sm:$0xff]  ;;  %v315_v24 = vld [vmem:[%s529_s9 + $0x28] sm:$0xff]  ;;  %v304_v26 = vadd.f32 %v444_v2, %v289_v13 }
  0x12   : > { %v328_v21 = vmul.f32 %v445_v1, %v313_v16  ;;  %v446_v25 = vld [vmem:[%s583_s5] ss:$0 sm:$0xff]  ;;  %v291_v27 = vmul.f32 %v443_v0, %v276_v17  ;;  %v329_v28 = vmul.f32 %v445_v1, %v314_v22  ;;  %v292_v29 = vmul.f32 %v443_v0, %v277_v23  ;;  %v278_v30 = vld [vmem:[%s523_s30 + $0x30] sm:$0xff]  ;;  %v279_v40 = vld [vmem:[%s523_s30 + $0x38] sm:$0xff] }
  0x13   : > { %v316_v31 = vld [vmem:[%s529_s9 + $0x30] sm:$0xff]  ;;  %v333_v32 = vadd.f32 %v325_v7, %v302_v18  ;;  %v334_v33 = vadd.f32 %v326_v12, %v303_v19  ;;  %v305_v34 = vadd.f32 %v444_v2, %v290_v20  ;;  %v330_v35 = vmul.f32 %v445_v1, %v315_v24  ;;  %v317_v41 = vld [vmem:[%s529_s9 + $0x38] sm:$0xff] }
  0x14   : > { %v335_v36 = vadd.f32 %v327_v14, %v304_v26  ;;  %v306_v37 = vadd.f32 %v444_v2, %v291_v27  ;;  %v307_v38 = vadd.f32 %v444_v2, %v292_v29  ;;  %v293_v39 = vmul.f32 %v443_v0, %v278_v30 }
  0x15   : > { %v348_v42 = vadd.f32 %v446_v25, %v333_v32  ;;  %v349_v43 = vadd.f32 %v446_v25, %v334_v33  ;;  %v336_v44 = vadd.f32 %v328_v21, %v305_v34  ;;  %v331_v45 = vmul.f32 %v445_v1, %v316_v31 }
  0x16   : > { %v350_v46 = vadd.f32 %v446_v25, %v335_v36  ;;  %v337_v47 = vadd.f32 %v329_v28, %v306_v37  ;;  %v338_v48 = vadd.f32 %v330_v35, %v307_v38  ;;  %v308_v49 = vadd.f32 %v444_v2, %v293_v39 }
  0x17   : > { %357 = vst.msk [vmem:[%s555_s16] sm:$0xff] %vm356_vm0, %v348_v42  ;;  %358 = vst.msk [vmem:[%s555_s16 + $0x8] sm:$0xff] %vm356_vm0, %v349_v43  ;;  %v351_v50 = vadd.f32 %v446_v25, %v336_v44  ;;  %v294_v51 = vmul.f32 %v443_v0, %v279_v40  ;;  %v332_v52 = vmul.f32 %v445_v1, %v317_v41 }
  0x18   : > { %359 = vst.msk [vmem:[%s555_s16 + $0x10] sm:$0xff] %vm356_vm0, %v350_v46  ;;  %v352_v53 = vadd.f32 %v446_v25, %v337_v47  ;;  %v353_v54 = vadd.f32 %v446_v25, %v338_v48  ;;  %v339_v55 = vadd.f32 %v331_v45, %v308_v49 }
  0x19   : > { %360 = vst.msk [vmem:[%s555_s16 + $0x18] sm:$0xff] %vm356_vm0, %v351_v50  ;;  %v309_v56 = vadd.f32 %v444_v2, %v294_v51 }
  0x1a   : > { %361 = vst.msk [vmem:[%s555_s16 + $0x20] sm:$0xff] %vm356_vm0, %v352_v53  ;;  %362 = vst.msk [vmem:[%s555_s16 + $0x28] sm:$0xff] %vm356_vm0, %v353_v54  ;;  %v354_v57 = vadd.f32 %v446_v25, %v339_v55 }
  0x1b   : > { %v340_v58 = vadd.f32 %v332_v52, %v309_v56 }
  0x1c   : > { %363 = vst.msk [vmem:[%s555_s16 + $0x30] sm:$0xff] %vm356_vm0, %v354_v57 }
  0x1d   : > { %v355_v59 = vadd.f32 %v446_v25, %v340_v58 }
  0x1f   : > { %364 = vst.msk [vmem:[%s555_s16 + $0x38] sm:$0xff] %vm356_vm0, %v355_v59 }
  0x20 PF: > { %s16_s21 = sadd.s32 1, %s466_s21  }
  0x21   : > { %p13_p4 = scmp.ge.s32.totalorder %s16_s21, 4  }
  0x23   :  { %15 = sbr.rel (!%p13_p4) target bundleno = 1 (0x1), region = 77 }

// kernel: resblock_forward.3
= control target key start
LH: loop header
LB: loop body
LE: loop exit
PB: predicated region body
PF: predicated region fallthrough
CT: control target
= control target key end

     0   :  { %s2004_s24 = smov 0   ;;  %s2366_s0 = inlined_call_operand.vmem [shape: f32[2,36,9,4], index: 0, kind: input, shape index: {}]   ;;  %s2367_s1 = inlined_call_operand.vmem [shape: bf16[9,4,8], index: 1, kind: input, shape index: {}]   ;;  %s2368_s2 = inlined_call_operand.vmem [shape: f32[1,8], index: 2, kind: input, shape index: {}]   ;;  %s2369_s3 = inlined_call_operand.vmem [shape: bf16[4,8], index: 3, kind: input, shape index: {}]   ;;  %s2370_s4 = inlined_call_operand.vmem [shape: bf16[2,64,8], index: 4, kind: output, shape index: {0}]   ;;  %s2371_s5 = inlined_call_operand.vmem [shape: f32[2,64,8], index: 5, kind: output, shape index: {1}]   ;;  %s2372_s6 = inlined_call_operand.vmem [shape: f32[2,2,8], index: 6, kind: output, shape index: {2}]   ;;  %s2373_s7 = inlined_call_operand.vmem [shape: f32[2,2,8], index: 7, kind: output, shape index: {3}]  }
   0x1 LB: > { %s1642_s25 = sadd.s32 4294967295, %s1962_s24   ;;  %p1646_p0 = scmp.ge.s32.totalorder %s1962_s24, 1  ;;  %s1962_s24 = sphi %s2004_s24, %s18_s24  }
   0x2   : > { %p244_p1 = scmp.lt.s32.totalorder %s1962_s24, 3 }
   0x4   : > { %p245_p2 = pnand %p1646_p0, %p244_p1 }
   0x6   : > { %248 = sbr.rel (%p245_p2) target bundleno = 325 (0x145), region = 36 }
   0xb   : > { %v1662_v0 = vld [vmem:[%s2367_s1 + $0x2] sm:$0x3]  ;;  %vm354_vm0 = vcmask 1041408   ;;  %v325_v1 = vld [vmem:[%s2367_s1] sm:$0x3]  ;;  %p289_p3 = scmp.lt.s32.totalorder %s1642_s25, 1 }
   0xc   : > { %1937 = vmatprep.subr.msk.bf16.mxu0 %vm354_vm0, %v1662_v0  ;;  %v356_v2 = vsel %vm354_vm0, %v1662_v0, 0  ;;  %1938 = vmatprep.subr.msk.bf16.mxu1 %vm354_vm0, %v325_v1  ;;  %v436_v3 = vsel %vm354_vm0, %v325_v1, 0  ;;  %v1671_v4 = vld [vmem:[%s2367_s1 + $0x4] sm:$0x3]  ;;  %v1684_v5 = vld [vmem:[%s2367_s1 + $0x6] sm:$0x3] }
   0xd   : > { %1838 = vmatpush3.bf16.msra.mxu0 %v356_v2  ;;  %1848 = vmatpush3.bf16.msra.mxu1 %v436_v3  ;;  %s2379_s25 = smov (!%p289_p3, %s1642_s25), 1  ;;  %vm341_vm1 = vcmask 31744   ;;  %v530_v17 = vsel %vm354_vm0, %v1671_v4, 0  ;;  %v633_v20 = vsel %vm354_vm0, %v1684_v5, 0  ;;  %v1697_v26 = vld [vmem:[%s2367_s1 + $0x8] sm:$0x3] }
   0xe   : > { %1939 = vmatprep.subr.msk.bf16.mxu0 %vm354_vm0, %v1671_v4  ;;  %1940 = vmatprep.subr.msk.bf16.mxu1 %vm354_vm0, %v1684_v5  ;;  %s1947_s11 = smul.u32 576, %s2379_s25  ;;  %v1710_v27 = vld [vmem:[%s2367_s1 + $0xa] sm:$0x3]  ;;  %v736_v50 = vsel %vm354_vm0, %v1697_v26, 0  ;;  %v1723_v54 = vld [vmem:[%s2367_s1 + $0xc] sm:$0x3] }
   0xf   : > { %v838_v52 = vsel %vm354_vm0, %v1710_v27, 0  ;;  %v1736_v55 = vld [vmem:[%s2367_s1 + $0xe] sm:$0x3]  ;;  %s1778_s29 = sshll.u32 %s2379_s25, 6  ;;  %vm1244_vm2 = vcmask 64512   ;;  %s1777_s12 = sshll.u32 %s2379_s25, 5 }
  0x10   : > { %s2036_s14 = scalar_lea.vmem %s2366_s0, %s1947_s11  ;;  %s2257_s9 = scalar_lea.vmem %s2371_s5, %s1778_s29  ;;  %vm1330_vm3 = vcmask 60416   ;;  %vm1266_vm4 = vcmask 57344  }
  0x11   : > { %v1654_v6 = vld [vmem:[%s2036_s14 + $0x90] sm:$0xff]  ;;  %v2040_v7 = vld [vmem:[%s2036_s14 + $0xa0] sm:$0xff]  ;;  %s2280_s15 = scalar_lea.vmem %s2370_s4, %s1777_s12  ;;  %s1652_s16 = sshll.u32 %s2379_s25, 1 }
  0x12   : > { %v313_v8 = vld [vmem:[%s2036_s14] sm:$0xff]  ;;  %v335_v9 = vpack.c.bf16 %v2040_v7, %v1654_v6  ;;  %v2045_v10 = vld [vmem:[%s2036_s14 + $0x10] sm:$0xff]  ;;  %s311_s19 = scalar_lea.vmem %s2373_s7, %s1652_s16  ;;  %s307_s21 = scalar_lea.vmem %s2372_s6, %s1652_s16 }
  0x13   : > { %v2048_v11 = vld [vmem:[%s2036_s14 + $0xb0] sm:$0xff]  ;;  %v2051_v12 = vld [vmem:[%s2036_s14 + $0xc0] sm:$0xff]  ;;  %v321_v13 = vpack.c.bf16 %v2045_v10, %v313_v8 }
  0x14   : > { %v336_v14 = vpack.c.bf16 %v2051_v12, %v2048_v11  ;;  %v2057_v15 = vld [vmem:[%s2036_s14 + $0x20] sm:$0xff]  ;;  %v2060_v16 = vld [vmem:[%s2036_s14 + $0x30] sm:$0xff]  ;;  %1839 = vmatprep.mubr.msk.bf16.mxu0 %vm341_vm1, %v335_v9 }
  0x15   : > { %v2064_v18 = vld [vmem:[%s2036_s14 + $0xd0] sm:$0xff]  ;;  %v322_v19 = vpack.c.bf16 %v2060_v16, %v2057_v15  ;;  %v2071_v21 = vld [vmem:[%s2036_s14 + $0xe0] sm:$0xff]  ;;  %1849 = vmatprep.mubr.msk.bf16.mxu1 %vm341_vm1, %v321_v13 }
  0x16   : > { %v2074_v22 = vld [vmem:[%s2036_s14 + $0x40] sm:$0xff]  ;;  %v2077_v23 = vld [vmem:[%s2036_s14 + $0x50] sm:$0xff]  ;;  %1840 = vmatmul.mubr.msk.bf16.vlgmr.msra.gmra.mxu0 %vm341_vm1, %v336_v14  ;;  %v337_v24 = vpack.c.bf16 %v2071_v21, %v2064_v18 }
  0x17   : > { %v323_v25 = vpack.c.bf16 %v2077_v23, %v2074_v22  ;;  %1850 = vmatmul.mubr.msk.bf16.vlgmr.msra.gmra.mxu1 %vm341_vm1, %v322_v19  ;;  %1858 = vmatpush3.bf16.msra.mxu0 %v530_v17  ;;  %v2093_v28 = vld [vmem:[%s2036_s14 + $0xf0] sm:$0xff]  ;;  %v2096_v29 = vld [vmem:[%s2036_s14 + $0x100] sm:$0xff] }
  0x18   : > { %v2099_v30 = vld [vmem:[%s2036_s14 + $0x60] sm:$0xff]  ;;  %1868 = vmatpush3.bf16.msra.mxu1 %v633_v20  ;;  %1843 = vmatprep.mubr.msk.bf16.mxu0 %vm341_vm1, %v337_v24  ;;  %v2103_v31 = vld [vmem:[%s2036_s14 + $0x70] sm:$0xff]  ;;  %v338_v36 = vpack.c.bf16 %v2096_v29, %v2093_v28  ;;  %v941_v24 = vsel %vm354_vm0, %v1723_v54, 0 }
  0x19   : > { %v503_v32 = vld [vmem:[%s2036_s14 + $0x1] sm:$0xff]  ;;  %v2107_v33 = vld [vmem:[%s2036_s14 + $0x11] sm:$0xff]  ;;  %1853 = vmatprep.mubr.msk.bf16.mxu1 %vm341_vm1, %v323_v25  ;;  %1941 = vmatprep.subr.msk.bf16.mxu0 %vm354_vm0, %v1697_v26  ;;  %v324_v37 = vpack.c.bf16 %v2103_v31, %v2099_v30  ;;  %v1044_v26 = vsel %vm354_vm0, %v1736_v55, 0 }
  0x1a   : > { %v1676_v34 = vld [vmem:[%s2036_s14 + $0x120] sm:$0xff]  ;;  %v1677_v35 = vld [vmem:[%s2036_s14 + $0x130] sm:$0xff]  ;;  %1942 = vmatprep.subr.msk.bf16.mxu1 %vm354_vm0, %v1710_v27  ;;  %v511_v38 = vpack.c.bf16 %v2107_v33, %v503_v32 }
  0x1b   : > { %v614_v39 = vpack.c.bf16 %v1677_v35, %v1676_v34  ;;  %v2123_v40 = vld [vmem:[%s2036_s14 + $0x21] sm:$0xff]  ;;  %v2126_v41 = vld [vmem:[%s2036_s14 + $0x31] sm:$0xff] }
  0x1c   : > { %v1678_v42 = vld [vmem:[%s2036_s14 + $0x140] sm:$0xff]  ;;  %v1679_v43 = vld [vmem:[%s2036_s14 + $0x150] sm:$0xff]  ;;  %v512_v46 = vpack.c.bf16 %v2126_v41, %v2123_v40 }
  0x1d   : > { %v2132_v44 = vld [vmem:[%s2036_s14 + $0x41] sm:$0xff]  ;;  %v2135_v45 = vld [vmem:[%s2036_s14 + $0x51] sm:$0xff]  ;;  %v615_v49 = vpack.c.bf16 %v1679_v43, %v1678_v42  ;;  %v922_v43 = vpack.c.bf16 %v2057_v15, %v2045_v10  ;;  %v1027_v15 = vpack.c.bf16 %v2093_v28, %v2071_v21  ;;  %v1127_v21 = vpack.c.bf16 %v2123_v40, %v2107_v33 }
  0x1e   : > { %1844 = vmatmul.mubr.msk.bf16.gmra.mxu0 %vm341_vm1, %v338_v36  ;;  %v1680_v47 = vld [vmem:[%s2036_s14 + $0x160] sm:$0xff]  ;;  %v1681_v48 = vld [vmem:[%s2036_s14 + $0x170] sm:$0xff]  ;;  %v513_v51 = vpack.c.bf16 %v2135_v45, %v2132_v44 }
  0x1f   : > { %1854 = vmatmul.mubr.msk.bf16.gmra.mxu1 %vm341_vm1, %v324_v37  ;;  %1859 = vmatprep.mubr.msk.bf16.mxu0 %vm341_vm1, %v511_v38  ;;  %v616_v53 = vpack.c.bf16 %v1681_v48, %v1680_v47  ;;  %v2154_v56 = vld [vmem:[%s2036_s14 + $0x61] sm:$0xff]  ;;  %v2157_v57 = vld [vmem:[%s2036_s14 + $0x71] sm:$0xff]  ;;  %v923_v47 = vpack.c.bf16 %v2074_v22, %v2060_v16  ;;  %v1026_v48 = vpack.c.bf16 %v2064_v18, %v2051_v12 }
  0x20   : > { %1869 = vmatprep.mubr.msk.bf16.mxu1 %vm341_vm1, %v614_v39  ;;  %v1682_v58 = vld [vmem:[%s2036_s14 + $0x180] sm:$0xff]  ;;  %v1683_v59 = vld [vmem:[%s2036_s14 + $0x190] sm:$0xff]  ;;  %v514_v0 = vpack.c.bf16 %v2157_v57, %v2154_v56  ;;  %v1128_v22 = vpack.c.bf16 %v2132_v44, %v2126_v41 }
  0x21   : > { %v1689_v60 = vld [vmem:[%s2036_s14 + $0x1b0] sm:$0xff]  ;;  %v1690_v61 = vld [vmem:[%s2036_s14 + $0x1c0] sm:$0xff]  ;;  %v617_v1 = vpack.c.bf16 %v1683_v59, %v1682_v58 }
  0x22   : > { %v1702_v62 = vld [vmem:[%s2036_s14 + $0x121] sm:$0xff]  ;;  %v1703_v63 = vld [vmem:[%s2036_s14 + $0x131] sm:$0xff]  ;;  %v717_v2 = vpack.c.bf16 %v1690_v61, %v1689_v60 }
  0x23   : > { %v819_v3 = vpack.c.bf16 %v1703_v63, %v1702_v62  ;;  %v1691_v4 = vld [vmem:[%s2036_s14 + $0x1d0] sm:$0xff]  ;;  %v1692_v5 = vld [vmem:[%s2036_s14 + $0x1e0] sm:$0xff] }
  0x24   : > { %v1704_v6 = vld [vmem:[%s2036_s14 + $0x141] sm:$0xff]  ;;  %v1705_v8 = vld [vmem:[%s2036_s14 + $0x151] sm:$0xff]  ;;  %v718_v14 = vpack.c.bf16 %v1692_v5, %v1691_v4 }
  0x25   : > { %v1693_v9 = vld [vmem:[%s2036_s14 + $0x1f0] sm:$0xff]  ;;  %v1694_v13 = vld [vmem:[%s2036_s14 + $0x200] sm:$0xff]  ;;  %v820_v20 = vpack.c.bf16 %v1705_v8, %v1704_v6 }
  0x26   : > { %1860 = vmatmul.mubr.msk.bf16.vlgmr.msra.gmra.mxu0 %vm341_vm1, %v512_v46  ;;  %v1706_v17 = vld [vmem:[%s2036_s14 + $0x161] sm:$0xff]  ;;  %v1707_v19 = vld [vmem:[%s2036_s14 + $0x171] sm:$0xff]  ;;  %v719_v25 = vpack.c.bf16 %v1694_v13, %v1693_v9  ;;  %v1025_v46 = vpack.c.bf16 %v2048_v11, %v2040_v7  ;;  %v924_v7 = vpack.c.bf16 %v2099_v30, %v2077_v23  ;;  %v1129_v23 = vpack.c.bf16 %v2154_v56, %v2135_v45 }
  0x27   : > { %1870 = vmatmul.mubr.msk.bf16.vlgmr.msra.gmra.mxu1 %vm341_vm1, %v615_v49  ;;  %1878 = vmatpush3.bf16.msra.mxu0 %v736_v50  ;;  %v821_v27 = vpack.c.bf16 %v1707_v19, %v1706_v17  ;;  %v1749_v32 = vld [vmem:[%s2367_s1 + $0x10] sm:$0x3]  ;;  %v1696_v35 = vld [vmem:[%s2036_s14 + $0x220] sm:$0xff] }
  0x28   : > { %1888 = vmatpush3.bf16.msra.mxu1 %v838_v52  ;;  %1863 = vmatprep.mubr.msk.bf16.mxu0 %vm341_vm1, %v513_v51  ;;  %v1695_v34 = vld [vmem:[%s2036_s14 + $0x210] sm:$0xff]  ;;  %v1351_v36 = vld [vmem:[%s2369_s3] sm:$0x3]  ;;  %v1146_v10 = vsel %vm354_vm0, %v1749_v32, 0 }
  0x29   : > { %1873 = vmatprep.mubr.msk.bf16.mxu1 %vm341_vm1, %v616_v53  ;;  %1943 = vmatprep.subr.msk.bf16.mxu0 %vm354_vm0, %v1723_v54  ;;  %v1708_v37 = vld [vmem:[%s2036_s14 + $0x181] sm:$0xff]  ;;  %v1709_v38 = vld [vmem:[%s2036_s14 + $0x191] sm:$0xff]  ;;  %v720_v39 = vpack.c.bf16 %v1696_v35, %v1695_v34  ;;  %v1365_v11 = vsel %vm354_vm0, %v1351_v36, 0 }
  0x2a   : > { %1944 = vmatprep.subr.msk.bf16.mxu1 %vm354_vm0, %v1736_v55  ;;  %v822_v42 = vpack.c.bf16 %v1709_v38, %v1708_v37  ;;  %v1722_v49 = vld [vmem:[%s2036_s14 + $0x80] sm:$0xff]  ;;  %v1735_v12 = vld [vmem:[%s2036_s14 + $0x110] sm:$0xff] }
  0x2b   : > { %v925_v16 = vpack.c.bf16 %v1722_v49, %v2103_v31  ;;  %v1028_v18 = vpack.c.bf16 %v1735_v12, %v2096_v29  ;;  %v1748_v28 = vld [vmem:[%s2036_s14 + $0x81] sm:$0xff] }
  0x2c   : > { %v1130_v29 = vpack.c.bf16 %v1748_v28, %v2157_v57 }
  0x2e   : > { %1864 = vmatmul.mubr.msk.bf16.gmra.mxu0 %vm341_vm1, %v514_v0 }
  0x2f   : > { %1874 = vmatmul.mubr.msk.bf16.gmra.mxu1 %vm341_vm1, %v617_v1  ;;  %1879 = vmatprep.mubr.msk.bf16.mxu0 %vm341_vm1, %v717_v2 }
  0x30   : > { %1889 = vmatprep.mubr.msk.bf16.mxu1 %vm341_vm1, %v819_v3 }
  0x36   : > { %1880 = vmatmul.mubr.msk.bf16.vlgmr.msra.gmra.mxu0 %vm341_vm1, %v718_v14 }
  0x37   : > { %1890 = vmatmul.mubr.msk.bf16.vlgmr.msra.gmra.mxu1 %vm341_vm1, %v820_v20  ;;  %1898 = vmatpush3.bf16.msra.mxu0 %v941_v24 }
  0x38   : > { %1908 = vmatpush3.bf16.msra.mxu1 %v1044_v26  ;;  %1883 = vmatprep.mubr.msk.bf16.mxu0 %vm341_vm1, %v719_v25 }
  0x39   : > { %1893 = vmatprep.mubr.msk.bf16.mxu1 %vm341_vm1, %v821_v27  ;;  %1945 = vmatprep.subr.msk.bf16.mxu0 %vm354_vm0, %v1749_v32 }
  0x3a   : > { %1946 = vmatprep.subr.msk.bf16.mxu1 %vm354_vm0, %v1351_v36 }
  0x3e   : > { %1884 = vmatmul.mubr.msk.bf16.gmra.mxu0 %vm341_vm1, %v720_v39 }
  0x3f   : > { %1894 = vmatmul.mubr.msk.bf16.gmra.mxu1 %vm341_vm1, %v822_v42  ;;  %1899 = vmatprep.mubr.msk.bf16.mxu0 %vm341_vm1, %v922_v43 }
  0x40   : > { %1909 = vmatprep.mubr.msk.bf16.mxu1 %vm341_vm1, %v1025_v46 }
  0x46   : > { %1900 = vmatmul.mubr.msk.bf16.vlgmr.msra.gmra.mxu0 %vm341_vm1, %v923_v47 }
  0x47   : > { %1910 = vmatmul.mubr.msk.bf16.vlgmr.msra.gmra.mxu1 %vm341_vm1, %v1026_v48  ;;  %1918 = vmatpush3.bf16.msra.mxu0 %v1146_v10 }
  0x48   : > { %1928 = vmatpush3.bf16.msra.mxu1 %v1365_v11  ;;  %1903 = vmatprep.mubr.msk.bf16.mxu0 %vm341_vm1, %v924_v7 }
  0x49   : > { %1913 = vmatprep.mubr.msk.bf16.mxu1 %vm341_vm1, %v1027_v15 }
  0x4e   : > { %1904 = vmatmul.mubr.msk.bf16.gmra.mxu0 %vm341_vm1, %v925_v16 }
  0x4f   : > { %1914 = vmatmul.mubr.msk.bf16.gmra.mxu1 %vm341_vm1, %v1028_v18  ;;  %1919 = vmatprep.mubr.msk.bf16.mxu0 %vm341_vm1, %v1127_v21 }
  0x50   : > { %1929 = vmatprep.mubr.msk.bf16.mxu1 %vm341_vm1, %v717_v2 }
  0x56   : > { %1920 = vmatmul.mubr.msk.bf16.vlgmr.msra.gmra.mxu0 %vm341_vm1, %v1128_v22 }
  0x57   : > { %1930 = vmatmul.mubr.msk.bf16.vlgmr.msra.gmra.mxu1 %vm341_vm1, %v718_v14  ;;  %1923 = vmatprep.mubr.msk.bf16.mxu0 %vm341_vm1, %v1129_v23 }
  0x58   : > { %1933 = vmatprep.mubr.msk.bf16.mxu1 %vm341_vm1, %v719_v25 }
  0x5e   : > { %1924 = vmatmul.mubr.msk.bf16.gmra.mxu0 %vm341_vm1, %v1130_v29 }
  0x5f   : > { %1934 = vmatmul.mubr.msk.bf16.gmra.mxu1 %vm341_vm1, %v720_v39 }
  0xd6   : > { %v1841_v30 = vpop.f32.mrf.mxu0 }
  0xd7   : > { %v1851_v31 = vpop.f32.mrf.mxu1 }
  0xd8   : > { %v392_v33 = vpop.f32.mrf.mxu0  ;;  %v481_v39 = vadd.f32 %v1851_v31, %v1841_v30 }
  0xd9   : > { %v472_v40 = vpop.f32.mrf.mxu1 }
  0xda   : > { %v1842_v41 = vpop.f32.mrf.mxu0  ;;  %v473_v46 = vadd.f32 %v472_v40, %v392_v33 }
  0xdb   : > { %v1852_v44 = vpop.f32.mrf.mxu1 }
  0xdc   : > { %v395_v45 = vpop.f32.mrf.mxu0  ;;  %v484_v7 = vadd.f32 %v1852_v44, %v1842_v41 }
  0xdd   : > { %v475_v50 = vpop.f32.mrf.mxu1 }
  0xde   : > { %v1845_v51 = vpop.f32.mrf.mxu0  ;;  %v476_v21 = vadd.f32 %v475_v50, %v395_v45 }
  0xdf   : > { %v1855_v52 = vpop.f32.mrf.mxu1 }
  0xe0   : > { %v408_v53 = vpop.f32.mrf.mxu0  ;;  %v497_v22 = vadd.f32 %v1855_v52, %v1845_v51 }
  0xe1   : > { %v488_v54 = vpop.f32.mrf.mxu1 }
  0xe2   : > { %v1846_v55 = vpop.f32.mrf.mxu0  ;;  %v489_v23 = vadd.f32 %v488_v54, %v408_v53 }
  0xe3   : > { %v1856_v56 = vpop.f32.mrf.mxu1 }
  0xe4   : > { %v411_v58 = vpop.f32.mrf.mxu0  ;;  %v500_v28 = vadd.f32 %v1856_v56, %v1846_v55 }
  0xe5   : > { %v491_v57 = vpop.f32.mrf.mxu1 }
  0xe6   : > { %v1861_v59 = vpop.f32.mrf.mxu0  ;;  %v492_v30 = vadd.f32 %v491_v57, %v411_v58 }
  0xe7   : > { %v1871_v60 = vpop.f32.mrf.mxu1  ;;  %v599_v47 = vadd.f32 %v1861_v59, %v481_v39 }
  0xe8   : > { %v566_v61 = vpop.f32.mrf.mxu0 }
  0xe9   : > { %v669_v62 = vpop.f32.mrf.mxu1  ;;  %v597_v11 = vadd.f32 %v566_v61, %v473_v46  ;;  %v702_v12 = vadd.f32 %v1871_v60, %v599_v47 }
  0xea   : > { %v1862_v63 = vpop.f32.mrf.mxu0 }
  0xeb   : > { %v1872_v0 = vpop.f32.mrf.mxu1  ;;  %v600_v16 = vadd.f32 %v1862_v63, %v484_v7  ;;  %v700_v31 = vadd.f32 %v669_v62, %v597_v11 }
  0xec   : > { %v569_v1 = vpop.f32.mrf.mxu0 }
  0xed   : > { %v672_v2 = vpop.f32.mrf.mxu1  ;;  %v598_v33 = vadd.f32 %v569_v1, %v476_v21  ;;  %v703_v44 = vadd.f32 %v1872_v0, %v600_v16 }
  0xee   : > { %v1865_v3 = vpop.f32.mrf.mxu0 }
  0xef   : > { %v1875_v4 = vpop.f32.mrf.mxu1  ;;  %v603_v40 = vadd.f32 %v1865_v3, %v497_v22  ;;  %v701_v51 = vadd.f32 %v672_v2, %v598_v33 }
  0xf0   : > { %v582_v5 = vpop.f32.mrf.mxu0 }
  0xf1   : > { %v685_v6 = vpop.f32.mrf.mxu1  ;;  %v601_v59 = vadd.f32 %v582_v5, %v489_v23  ;;  %v706_v52 = vadd.f32 %v1875_v4, %v603_v40 }
  0xf2   : > { %v1866_v8 = vpop.f32.mrf.mxu0 }
  0xf3   : > { %v1876_v9 = vpop.f32.mrf.mxu1  ;;  %v604_v39 = vadd.f32 %v1866_v8, %v500_v28  ;;  %v704_v53 = vadd.f32 %v685_v6, %v601_v59 }
  0xf4   : > { %v585_v13 = vpop.f32.mrf.mxu0 }
  0xf5   : > { %v688_v14 = vpop.f32.mrf.mxu1  ;;  %v602_v61 = vadd.f32 %v585_v13, %v492_v30  ;;  %v707_v54 = vadd.f32 %v1876_v9, %v604_v39 }
  0xf6   : > { %v1881_v17 = vpop.f32.mrf.mxu0 }
  0xf7   : > { %v1891_v19 = vpop.f32.mrf.mxu1  ;;  %v705_v56 = vadd.f32 %v688_v14, %v602_v61 }
  0xf8   : > { %v772_v20 = vpop.f32.mrf.mxu0 }
  0xf9   : > { %v874_v24 = vpop.f32.mrf.mxu1  ;;  %v803_v46 = vadd.f32 %v772_v20, %v700_v31 }
  0xfa   : > { %v1882_v25 = vpop.f32.mrf.mxu0 }
  0xfb   : > { %v1892_v26 = vpop.f32.mrf.mxu1  ;;  %v806_v45 = vadd.f32 %v1882_v25, %v703_v44  ;;  %v905_v58 = vadd.f32 %v874_v24, %v803_v46 }
  0xfc   : > { %v775_v27 = vpop.f32.mrf.mxu0 }
  0xfd   : > { %v2245_v32 = vpop.f32.mrf.mxu1  ;;  %v804_v1 = vadd.f32 %v775_v27, %v701_v51  ;;  %v908_v13 = vadd.f32 %v1892_v26, %v806_v45 }
  0xfe   : > { %v1885_v34 = vpop.f32.mrf.mxu0 }
  0xff   : > { %v2247_v35 = vpop.f32.mrf.mxu1  ;;  %v809_v3 = vadd.f32 %v1885_v34, %v706_v52  ;;  %v906_v9 = vadd.f32 %v2245_v32, %v804_v1 }
 0x100   : > { %v788_v36 = vpop.f32.mrf.mxu0 }
 0x101   : > { %v2249_v37 = vpop.f32.mrf.mxu1  ;;  %v807_v0 = vadd.f32 %v788_v36, %v704_v53  ;;  %v911_v14 = vadd.f32 %v2247_v35, %v809_v3 }
 0x102   : > { %2374 = vst [vmem:[#allocation2_spill] sm:$0xff] %v2249_v37  ;;  %v1886_v38 = vpop.f32.mrf.mxu0 }
 0x103   : > { %v2251_v42 = vpop.f32.mrf.mxu1  ;;  %v810_v5 = vadd.f32 %v1886_v38, %v707_v54  ;;  %v2266_v38 = vld [vmem:[%s2368_s2] ss:$0 sm:$0xff] }
 0x104   : > { %2375 = vst [vmem:[#allocation3_spill] sm:$0xff] %v2251_v42  ;;  %v791_v43 = vpop.f32.mrf.mxu0  ;;  %v805_v42 = vadd.f32 %v1881_v17, %v702_v12 }
 0x105   : > { %v893_v48 = vpop.f32.mrf.mxu1  ;;  %v808_v17 = vadd.f32 %v791_v43, %v705_v56 }
 0x106   : > { %v1901_v10 = vpop.f32.mrf.mxu0  ;;  %v907_v47 = vadd.f32 %v1891_v19, %v805_v42 }
 0x107   : > { %v1911_v15 = vpop.f32.mrf.mxu1  ;;  %v910_v42 = vadd.f32 %v893_v48, %v808_v17 }
 0x108   : > { %v977_v49 = vpop.f32.mrf.mxu0  ;;  %v1010_v57 = vadd.f32 %v1901_v10, %v907_v47 }
 0x109   : > { %v1080_v18 = vpop.f32.mrf.mxu1  ;;  %v1008_v19 = vadd.f32 %v977_v49, %v905_v58  ;;  %v2376_v24 = vld [vmem:[#allocation2_spill] sm:$0xff] }
 0x10a   : > { %v1902_v29 = vpop.f32.mrf.mxu0  ;;  %v1113_v2 = vadd.f32 %v1911_v15, %v1010_v57  ;;  %v909_v26 = vadd.f32 %v2376_v24, %v807_v0 }
 0x10b   : > { %v1912_v37 = vpop.f32.mrf.mxu1  ;;  %v1011_v4 = vadd.f32 %v1902_v29, %v908_v13  ;;  %v2377_v27 = vld [vmem:[#allocation3_spill] sm:$0xff]  ;;  %v1111_v43 = vadd.f32 %v1080_v18, %v1008_v19 }
 0x10c   : > { %v980_v41 = vpop.f32.mrf.mxu0  ;;  %v912_v34 = vadd.f32 %v2377_v27, %v810_v5 }
 0x10d   : > { %v1083_v60 = vpop.f32.mrf.mxu1  ;;  %v1009_v11 = vadd.f32 %v980_v41, %v906_v9  ;;  %v1114_v12 = vadd.f32 %v1912_v37, %v1011_v4 }
 0x10e   : > { %v1905_v63 = vpop.f32.mrf.mxu0 }
 0x10f   : > { %v1915_v50 = vpop.f32.mrf.mxu1  ;;  %v1014_v32 = vadd.f32 %v1905_v63, %v911_v14  ;;  %v1112_v33 = vadd.f32 %v1083_v60, %v1009_v11 }
 0x110   : > { %v993_v55 = vpop.f32.mrf.mxu0 }
 0x111   : > { %v1096_v62 = vpop.f32.mrf.mxu1  ;;  %v1012_v15 = vadd.f32 %v993_v55, %v909_v26  ;;  %v1117_v37 = vadd.f32 %v1915_v50, %v1014_v32 }
 0x112   : > { %v1906_v8 = vpop.f32.mrf.mxu0 }
 0x113   : > { %v1916_v20 = vpop.f32.mrf.mxu1  ;;  %v1015_v35 = vadd.f32 %v1906_v8, %v912_v34  ;;  %v1115_v40 = vadd.f32 %v1096_v62, %v1012_v15 }
 0x114   : > { %v996_v25 = vpop.f32.mrf.mxu0 }
 0x115   : > { %v1099_v6 = vpop.f32.mrf.mxu1  ;;  %v1013_v23 = vadd.f32 %v996_v25, %v910_v42  ;;  %v2275_v59 = vadd.f32 %v1916_v20, %v1015_v35 }
 0x116   : > { %v1921_v36 = vpop.f32.mrf.mxu0 }
 0x117   : > { %v1215_v10 = vadd.f32 %v1921_v36, %v1113_v2  ;;  %v1931_v7 = vpop.f32.mrf.mxu1  ;;  %v2285_v60 = vadd.f32 %v1099_v6, %v1013_v23 }
 0x118   : > { %1434 = vst.msk [vmem:[%s2257_s9 + $0x10] sm:$0xff] %vm1244_vm2, %v1931_v7  ;;  %v1182_v49 = vpop.f32.mrf.mxu0  ;;  %v1464_v28 = vmul.f32 %v1931_v7, %v1931_v7  ;;  %v1443_v52 = vsel %vm1244_vm2, %v1931_v7, 0.0 }
 0x119   : > { %v1230_v16 = vadd.f32 %v2266_v38, %v1215_v10  ;;  %v1213_v21 = vadd.f32 %v1182_v49, %v1111_v43  ;;  %v1401_v22 = vpop.f32.mrf.mxu1 }
 0x11a   : > { %1432 = vst.msk [vmem:[%s2257_s9] sm:$0xff] %vm1244_vm2, %v1401_v22  ;;  %v1922_v48 = vpop.f32.mrf.mxu0  ;;  %v1440_v61 = vsel %vm1244_vm2, %v1401_v22, 0.0  ;;  %v1462_v46 = vmul.f32 %v1401_v22, %v1401_v22  ;;  %v1473_v53 = vsel %vm1244_vm2, %v1464_v28, 0.0 }
 0x11b   : > { %v1238_v18 = vmax.f32 %v1230_v16, 0.0  ;;  %v1228_v29 = vadd.f32 %v2266_v38, %v1213_v21  ;;  %v1216_v30 = vadd.f32 %v1922_v48, %v1114_v12  ;;  %v1932_v31 = vpop.f32.mrf.mxu1 }
 0x11c   : > { %1435 = vst.msk [vmem:[%s2257_s9 + $0x18] sm:$0xff] %vm1244_vm2, %v1932_v31  ;;  %v1185_v39 = vpop.f32.mrf.mxu0  ;;  %v1470_v0 = vsel %vm1244_vm2, %v1462_v46, 0.0  ;;  %v1445_v5 = vsel %vm1244_vm2, %v1932_v31, 0.0  ;;  %v1465_v8 = vmul.f32 %v1932_v31, %v1932_v31 }
 0x11d   : > { %v1781_v41 = vpack.c.bf16 %v1238_v18, %v1238_v18  ;;  %v1236_v44 = vmax.f32 %v1228_v29, 0.0  ;;  %v1404_v63 = vpop.f32.mrf.mxu1  ;;  %v1231_v47 = vadd.f32 %v2266_v38, %v1216_v30  ;;  %v1214_v45 = vadd.f32 %v1185_v39, %v1112_v33 }
 0x11e   : > { %1433 = vst.msk [vmem:[%s2257_s9 + $0x8] sm:$0xff] %vm1244_vm2, %v1404_v63  ;;  %v1441_v50 = vsel %vm1244_vm2, %v1404_v63, 0.0  ;;  %v1925_v51 = vpop.f32.mrf.mxu0  ;;  %v1463_v1 = vmul.f32 %v1404_v63, %v1404_v63  ;;  %v1248_v19 = vsel %vm1244_vm2, %v1238_v18, 0.0  ;;  %v1270_v20 = vmul.f32 %v1238_v18, %v1238_v18 }
 0x11f   : > { %1333 = vst.msk [vmem:[%s2280_s15 + $0x8] sm:$0xf] %vm1330_vm3, %v1781_v41  ;;  %v1268_v54 = vmul.f32 %v1236_v44, %v1236_v44  ;;  %v1779_v55 = vpack.c.bf16 %v1236_v44, %v1236_v44  ;;  %v1935_v56 = vpop.f32.mrf.mxu1  ;;  %v1239_v58 = vmax.f32 %v1231_v47, 0.0  ;;  %v1229_v57 = vadd.f32 %v2266_v38, %v1214_v45 }
 0x120   : > { %v1442_v62 = vadd.f32 %v1441_v50, %v1440_v61  ;;  %1438 = vst.msk [vmem:[%s2257_s9 + $0x30] sm:$0xff] %vm1244_vm2, %v1935_v56  ;;  %v1198_v3 = vpop.f32.mrf.mxu0  ;;  %v1219_v13 = vadd.f32 %v1925_v51, %v1117_v37  ;;  %v1245_v4 = vsel %vm1244_vm2, %v1236_v44, 0.0  ;;  %v1471_v9 = vsel %vm1244_vm2, %v1463_v1, 0.0 }
 0x121   : > { %1331 = vst.msk [vmem:[%s2280_s15] sm:$0xf] %vm1330_vm3, %v1779_v55  ;;  %v1417_v17 = vpop.f32.mrf.mxu1  ;;  %v1782_v25 = vpack.c.bf16 %v1239_v58, %v1239_v58  ;;  %v1237_v2 = vmax.f32 %v1229_v57, 0.0  ;;  %v1276_v26 = vsel %vm1244_vm2, %v1268_v54, 0.0  ;;  %v1472_v10 = vadd.f32 %v1471_v9, %v1470_v0 }
 0x122   : > { %1436 = vst.msk [vmem:[%s2257_s9 + $0x20] sm:$0xff] %vm1244_vm2, %v1417_v17  ;;  %v1444_v6 = vadd.f32 %v1443_v52, %v1442_v62  ;;  %v1234_v14 = vadd.f32 %v2266_v38, %v1219_v13  ;;  %v1926_v42 = vpop.f32.mrf.mxu0  ;;  %v1217_v11 = vadd.f32 %v1198_v3, %v1115_v40  ;;  %v1447_v49 = vsel %vm1244_vm2, %v1417_v17, 0.0 }
 0x123   : > { %v1936_v24 = vpop.f32.mrf.mxu1  ;;  %1334 = vst.msk [vmem:[%s2280_s15 + $0xc] sm:$0xf] %vm1330_vm3, %v1782_v25  ;;  %v1246_v27 = vsel %vm1244_vm2, %v1237_v2, 0.0  ;;  %v1269_v34 = vmul.f32 %v1237_v2, %v1237_v2  ;;  %v1780_v36 = vpack.c.bf16 %v1237_v2, %v1237_v2  ;;  %v1466_v12 = vmul.f32 %v1417_v17, %v1417_v17 }
 0x124   : > { %1439 = vst.msk [vmem:[%s2257_s9 + $0x38] sm:$0xff] %vm1244_vm2, %v1936_v24  ;;  %v1247_v43 = vadd.f32 %v1246_v27, %v1245_v4  ;;  %v1242_v7 = vmax.f32 %v1234_v14, 0.0  ;;  %v1446_v35 = vadd.f32 %v1445_v5, %v1444_v6  ;;  %v1271_v16 = vmul.f32 %v1239_v58, %v1239_v58  ;;  %v1201_v30 = vpop.f32.mrf.mxu0 }
 0x125   : > { %v1420_v32 = vpop.f32.mrf.mxu1  ;;  %v1277_v15 = vsel %vm1244_vm2, %v1269_v34, 0.0  ;;  %1332 = vst.msk [vmem:[%s2280_s15 + $0x4] sm:$0xf] %vm1330_vm3, %v1780_v36  ;;  %v1474_v23 = vadd.f32 %v1473_v53, %v1472_v10  ;;  %v1279_v48 = vsel %vm1244_vm2, %v1270_v20, 0.0  ;;  %v1475_v18 = vsel %vm1244_vm2, %v1465_v8, 0.0 }
 0x126   : > { %1437 = vst.msk [vmem:[%s2257_s9 + $0x28] sm:$0xff] %vm1244_vm2, %v1420_v32  ;;  %v1249_v21 = vadd.f32 %v1248_v19, %v1247_v43  ;;  %v1278_v22 = vadd.f32 %v1277_v15, %v1276_v26  ;;  %v1785_v28 = vpack.c.bf16 %v1242_v7, %v1242_v7  ;;  %v1232_v29 = vadd.f32 %v2266_v38, %v1217_v11 }
 0x127   : > { %v1250_v31 = vsel %vm1244_vm2, %v1239_v58, 0.0  ;;  %v1448_v37 = vadd.f32 %v1447_v49, %v1446_v35  ;;  %v1476_v40 = vadd.f32 %v1475_v18, %v1474_v23  ;;  %v1477_v44 = vsel %vm1244_vm2, %v1466_v12, 0.0 }
 0x128   : > { %v1280_v33 = vadd.f32 %v1279_v48, %v1278_v22  ;;  %1337 = vst.msk [vmem:[%s2280_s15 + $0x18] sm:$0xf] %vm1330_vm3, %v1785_v28  ;;  %v1240_v39 = vmax.f32 %v1232_v29, 0.0  ;;  %v1251_v41 = vadd.f32 %v1250_v31, %v1249_v21  ;;  %v1220_v61 = vadd.f32 %v1926_v42, %v2275_v59 }
 0x129   : > { %v1281_v46 = vsel %vm1244_vm2, %v1271_v16, 0.0  ;;  %v1451_v63 = vsel %vm1244_vm2, %v1935_v56, 0.0  ;;  %v1468_v47 = vmul.f32 %v1935_v56, %v1935_v56  ;;  %v1218_v45 = vadd.f32 %v1201_v30, %v2285_v60 }
 0x12a   : > { %v1272_v50 = vmul.f32 %v1240_v39, %v1240_v39  ;;  %v1282_v51 = vadd.f32 %v1281_v46, %v1280_v33  ;;  %v1783_v52 = vpack.c.bf16 %v1240_v39, %v1240_v39  ;;  %v1235_v53 = vadd.f32 %v2266_v38, %v1220_v61 }
 0x12b   : > { %v1252_v54 = vsel %vm1244_vm2, %v1240_v39, 0.0  ;;  %v1478_v55 = vadd.f32 %v1477_v44, %v1476_v40  ;;  %v1233_v58 = vadd.f32 %v2266_v38, %v1218_v45  ;;  %v1449_v57 = vsel %vm1244_vm2, %v1420_v32, 0.0 }
 0x12c   : > { %v1253_v59 = vadd.f32 %v1252_v54, %v1251_v41  ;;  %1335 = vst.msk [vmem:[%s2280_s15 + $0x10] sm:$0xf] %vm1330_vm3, %v1783_v52  ;;  %v1243_v62 = vmax.f32 %v1235_v53, 0.0  ;;  %v1450_v56 = vadd.f32 %v1449_v57, %v1448_v37  ;;  %v1467_v1 = vmul.f32 %v1420_v32, %v1420_v32 }
 0x12d   : > { %v1274_v60 = vmul.f32 %v1242_v7, %v1242_v7  ;;  %v1283_v3 = vsel %vm1244_vm2, %v1272_v50, 0.0  ;;  %v1453_v0 = vsel %vm1244_vm2, %v1936_v24, 0.0  ;;  %v1241_v5 = vmax.f32 %v1233_v58, 0.0 }
 0x12e   : > { %v1284_v8 = vadd.f32 %v1283_v3, %v1282_v51  ;;  %v1786_v13 = vpack.c.bf16 %v1243_v62, %v1243_v62  ;;  %v1469_v17 = vmul.f32 %v1936_v24, %v1936_v24  ;;  %v1452_v38 = vadd.f32 %v1451_v63, %v1450_v56 }
 0x12f   : > { %v1254_v19 = vsel %vm1244_vm2, %v1241_v5, 0.0  ;;  %v1273_v20 = vmul.f32 %v1241_v5, %v1241_v5  ;;  %v1784_v25 = vpack.c.bf16 %v1241_v5, %v1241_v5  ;;  %v1479_v2 = vsel %vm1244_vm2, %v1467_v1, 0.0 }
 0x130   : > { %1338 = vst.msk [vmem:[%s2280_s15 + $0x1c] sm:$0xf] %vm1330_vm3, %v1786_v13  ;;  %v1255_v4 = vadd.f32 %v1254_v19, %v1253_v59  ;;  %v1454_v6 = vadd.f32 %v1453_v0, %v1452_v38  ;;  %v1480_v9 = vadd.f32 %v1479_v2, %v1478_v55  ;;  %v1256_v14 = vsel %vm1244_vm2, %v1242_v7, 0.0 }
 0x131   : > { %v1481_v26 = vsel %vm1244_vm2, %v1468_v47, 0.0  ;;  %v1275_v27 = vmul.f32 %v1243_v62, %v1243_v62  ;;  %v1285_v34 = vsel %vm1244_vm2, %v1273_v20, 0.0  ;;  %1336 = vst.msk [vmem:[%s2280_s15 + $0x14] sm:$0xf] %vm1330_vm3, %v1784_v25  ;;  %v1287_v10 = vsel %vm1244_vm2, %v1274_v60, 0.0 }
 0x132   : > { %v1257_v24 = vadd.f32 %v1256_v14, %v1255_v4  ;;  %v1286_v36 = vadd.f32 %v1285_v34, %v1284_v8  ;;  %v1455_v42 = vrot.slane %v1454_v6, 4  ;;  %v1482_v43 = vadd.f32 %v1481_v26, %v1480_v9 }
 0x133   : > { %v1258_v11 = vsel %vm1244_vm2, %v1243_v62, 0.0  ;;  %v1483_v32 = vsel %vm1244_vm2, %v1469_v17, 0.0  ;;  %v1289_v12 = vsel %vm1244_vm2, %v1275_v27, 0.0 }
 0x134   : > { %v1259_v15 = vadd.f32 %v1258_v11, %v1257_v24  ;;  %v1288_v7 = vadd.f32 %v1287_v10, %v1286_v36  ;;  %v1456_v35 = vadd.f32 %v1455_v42, %v1454_v6  ;;  %v1484_v49 = vadd.f32 %v1483_v32, %v1482_v43 }
 0x136   : > { %v1260_v16 = vrot.slane %v1259_v15, 4  ;;  %v1290_v21 = vadd.f32 %v1289_v12, %v1288_v7  ;;  %v1457_v22 = vrot.slane %v1456_v35, 2  ;;  %v1485_v23 = vrot.slane %v1484_v49, 4 }
 0x138   : > { %v1261_v48 = vadd.f32 %v1260_v16, %v1259_v15  ;;  %v1291_v18 = vrot.slane %v1290_v21, 4  ;;  %v1458_v28 = vadd.f32 %v1457_v22, %v1456_v35  ;;  %v1486_v29 = vadd.f32 %v1485_v23, %v1484_v49 }
 0x13a   : > { %v1262_v30 = vrot.slane %v1261_v48, 2  ;;  %v1292_v31 = vadd.f32 %v1291_v18, %v1290_v21  ;;  %v1459_v33 = vrot.slane %v1458_v28, 1  ;;  %v1487_v37 = vrot.slane %v1486_v29, 2 }
 0x13c   : > { %v1263_v40 = vadd.f32 %v1262_v30, %v1261_v48  ;;  %v1293_v39 = vrot.slane %v1292_v31, 2  ;;  %v1460_v41 = vadd.f32 %v1459_v33, %v1458_v28  ;;  %v1488_v44 = vadd.f32 %v1487_v37, %v1486_v29 }
 0x13e   : > { %v1264_v61 = vrot.slane %v1263_v40, 1  ;;  %v1294_v46 = vadd.f32 %v1293_v39, %v1292_v31  ;;  %1461 = vst.msk [vmem:[%s311_s19] sm:$0x1] %vm1266_vm4, %v1460_v41  ;;  %v1489_v63 = vrot.slane %v1488_v44, 1 }
 0x140   : > { %v1265_v47 = vadd.f32 %v1264_v61, %v1263_v40  ;;  %v1295_v45 = vrot.slane %v1294_v46, 1  ;;  %v1490_v50 = vadd.f32 %v1489_v63, %v1488_v44 }
 0x142   : > { %v1296_v51 = vadd.f32 %v1295_v45, %v1294_v46  ;;  %1267 = vst.msk [vmem:[%s307_s21] sm:$0x1] %vm1266_vm4, %v1265_v47  ;;  %1491 = vst.msk [vmem:[%s311_s19 + $0x1] sm:$0x1] %vm1266_vm4, %v1490_v50 }
 0x144   : > { %1297 = vst.msk [vmem:[%s307_s21 + $0x1] sm:$0x1] %vm1266_vm4, %v1296_v51 }
 0x145 PF: > { %s18_s24 = sadd.s32 1, %s1962_s24  }
 0x146   : > { %p15_p4 = scmp.ge.s32.totalorder %s18_s24, 4  }
 0x148   :  { %17 = sbr.rel (!%p15_p4) target bundleno = 1 (0x1), region = 115 }

// kernel: resblock_forward.4
= control target key start
LH: loop header
LB: loop body
LE: loop exit
PB: predicated region body
PF: predicated region fallthrough
CT: control target
= control target key end

     0   :  { %s1638_s18 = smov 0   ;;  %s1900_s0 = inlined_call_operand.vmem [shape: bf16[2,64,8], index: 0, kind: input, shape index: {}]   ;;  %s1901_s1 = inlined_call_operand.vmem [shape: f32[1,8], index: 1, kind: input, shape index: {}]   ;;  %s1902_s2 = inlined_call_operand.vmem [shape: f32[1,8], index: 2, kind: input, shape index: {}]   ;;  %s1903_s3 = inlined_call_operand.vmem [shape: bf16[9,8,8], index: 3, kind: input, shape index: {}]   ;;  %s1904_s4 = inlined_call_operand.vmem [shape: f32[2,64,8], index: 4, kind: output, shape index: {0}]   ;;  %s1905_s5 = inlined_call_operand.vmem [shape: f32[2,2,8], index: 5, kind: output, shape index: {1}]  }
   0x1 LB: > { %s1364_s19 = sadd.s32 4294967295, %s1605_s18   ;;  %p1368_p0 = scmp.ge.s32.totalorder %s1605_s18, 1  ;;  %s1605_s18 = sphi %s1638_s18, %s16_s18  }
   0x2   : > { %p190_p1 = scmp.lt.s32.totalorder %s1605_s18, 3 }
   0x4   : > { %p191_p2 = pnand %p1368_p0, %p190_p1 }
   0x5   : > { %p1649_p3 = scmp.lt.s32.totalorder (!%p191_p2), %s1364_s19, 1 }
   0x6   : > { %194 = sbr.rel (%p191_p2) target bundleno = 325 (0x145), region = 36 }
   0xb   : > { %v1376_v0 = vld [vmem:[%s1903_s3 + $0x4] sm:$0xf]  ;;  %vm353_vm0 = vcmask 1043456   ;;  %vm237_vm1 = vcmask 64512   ;;  %v1607_v2 = vmov 0.0   ;;  %vm239_vm2 = vcmask 58368  }
   0xc   : > { %1581 = vmatprep.subr.msk.bf16.mxu1 %vm353_vm0, %v1376_v0  ;;  %1580 = vmatprep.subr.msk.bf16.mxu0 %vm353_vm0, %v1376_v0  ;;  %v355_v1 = vsel %vm353_vm0, %v1376_v0, 0  ;;  %238 = vst.msk [vmem:[#allocation2] sm:$0xff] %vm237_vm1, %v1607_v2  ;;  %241 = vst.msk [vmem:[#allocation2 + $0x10] sm:$0xff] %vm237_vm1, %v1607_v2  ;;  %s1908_s19 = smov (!%p1649_p3, %s1364_s19), 1  ;;  %v326_v3 = vld [vmem:[%s1903_s3] sm:$0xf] }
   0xd   : > { %243 = vst.msk [vmem:[#allocation2 + $0x20] sm:$0xff] %vm237_vm1, %v1607_v2  ;;  %245 = vst.msk [vmem:[#allocation2 + $0x30] sm:$0xff] %vm237_vm1, %v1607_v2  ;;  %1579 = vmatpush3.bf16.msra.mxu1 %v355_v1  ;;  %1489 = vmatpush3.bf16.msra.mxu0 %v355_v1  ;;  %v1385_v4 = vld [vmem:[%s1903_s3 + $0x8] sm:$0xf]  ;;  %s1422_s27 = sshll.u32 %s1908_s19, 5  ;;  %v435_v52 = vsel %vm353_vm0, %v326_v3, 0 }
   0xe   : > { %247 = vst.msk [vmem:[#allocation2 + $0x40] sm:$0xff] %vm237_vm1, %v1607_v2  ;;  %249 = vst.msk [vmem:[#allocation2 + $0x50] sm:$0xff] %vm237_vm1, %v1607_v2  ;;  %1582 = vmatprep.subr.msk.bf16.mxu1 %vm353_vm0, %v326_v3  ;;  %1583 = vmatprep.subr.msk.bf16.mxu0 %vm353_vm0, %v1385_v4  ;;  %s226_s30 = scalar_lea.vmem %s1900_s0, %s1422_s27  ;;  %v1374_v5 = vld [vmem:[%s1901_s1] ss:$0 sm:$0xff]  ;;  %v529_v48 = vsel %vm353_vm0, %v1385_v4, 0  ;;  %s1423_s24 = sshll.u32 %s1908_s19, 6 }
   0xf   : > { %251 = vst.msk [vmem:[#allocation2 + $0x60] sm:$0xff] %vm237_vm1, %v1607_v2  ;;  %253 = vst.msk [vmem:[#allocation2 + $0x70] sm:$0xff] %vm237_vm1, %v1607_v2  ;;  %v1425_v6 = vld [vmem:[%s226_s30] sm:$0xff]   ;;  %v1440_v7 = vld [vmem:[%s226_s30 + $0x8] sm:$0xff]   ;;  %s1856_s27 = scalar_lea.vmem %s1904_s4, %s1423_s24  ;;  %s1373_s28 = sshll.u32 %s1908_s19, 1  ;;  %vm1246_vm3 = vcmask 57344  }
  0x10   : > { %255 = vst.msk [vmem:[#allocation2 + $0x80] sm:$0xff] %vm237_vm1, %v1607_v2  ;;  %257 = vst.msk [vmem:[#allocation2 + $0x90] sm:$0xff] %vm237_vm1, %v1607_v2  ;;  %v1441_v8 = vld [vmem:[%s226_s30 + $0x10] sm:$0xff]   ;;  %v1426_v9 = vunpack.c.l.bf16 %v1425_v6  ;;  %v1427_v10 = vunpack.c.h.bf16 %v1425_v6  ;;  %v1430_v11 = vunpack.c.l.bf16 %v1440_v7  ;;  %v1431_v12 = vunpack.c.h.bf16 %v1440_v7  ;;  %v1442_v13 = vld [vmem:[%s226_s30 + $0x18] sm:$0xff]   ;;  %s235_s6 = scalar_lea.vmem %s1905_s5, %s1373_s28 }
  0x11   : > { %240 = vst.msk [vmem:[#allocation2 + $0x8] sm:$0x3] %vm239_vm2, %v1607_v2  ;;  %242 = vst.msk [vmem:[#allocation2 + $0x18] sm:$0x3] %vm239_vm2, %v1607_v2  ;;  %v1375_v14 = vld [vmem:[%s1902_s2] ss:$0 sm:$0xff]  ;;  %v1434_v15 = vunpack.c.l.bf16 %v1441_v8  ;;  %v1435_v16 = vunpack.c.h.bf16 %v1441_v8  ;;  %v1438_v17 = vunpack.c.l.bf16 %v1442_v13  ;;  %v1439_v18 = vunpack.c.h.bf16 %v1442_v13 }
  0x12   : > { %244 = vst.msk [vmem:[#allocation2 + $0x28] sm:$0x3] %vm239_vm2, %v1607_v2  ;;  %246 = vst.msk [vmem:[#allocation2 + $0x38] sm:$0x3] %vm239_vm2, %v1607_v2  ;;  %v282_v19 = vmul.f32 %v1426_v9, %v1374_v5  ;;  %v285_v20 = vmul.f32 %v1431_v12, %v1374_v5  ;;  %v283_v21 = vmul.f32 %v1427_v10, %v1374_v5  ;;  %v1390_v55 = vld [vmem:[%s1903_s3 + $0xc] sm:$0xf] }
  0x13   : > { %248 = vst.msk [vmem:[#allocation2 + $0x48] sm:$0x3] %vm239_vm2, %v1607_v2  ;;  %250 = vst.msk [vmem:[#allocation2 + $0x58] sm:$0x3] %vm239_vm2, %v1607_v2  ;;  %v284_v22 = vmul.f32 %v1430_v11, %v1374_v5  ;;  %v286_v23 = vmul.f32 %v1434_v15, %v1374_v5  ;;  %v287_v24 = vmul.f32 %v1435_v16, %v1374_v5  ;;  %v314_v36 = vld [vmem:[#allocation2] sm:$0xff] }
  0x14   : > { %252 = vst.msk [vmem:[#allocation2 + $0x68] sm:$0x3] %vm239_vm2, %v1607_v2  ;;  %254 = vst.msk [vmem:[#allocation2 + $0x78] sm:$0x3] %vm239_vm2, %v1607_v2  ;;  %v288_v25 = vmul.f32 %v1438_v17, %v1374_v5  ;;  %v289_v26 = vmul.f32 %v1439_v18, %v1374_v5  ;;  %v297_v27 = vadd.f32 %v1375_v14, %v282_v19  ;;  %v1395_v58 = vld [vmem:[%s1903_s3 + $0x10] sm:$0xf] }
  0x15   : > { %256 = vst.msk [vmem:[#allocation2 + $0x88] sm:$0x3] %vm239_vm2, %v1607_v2  ;;  %258 = vst.msk [vmem:[#allocation2 + $0x98] sm:$0x3] %vm239_vm2, %v1607_v2  ;;  %v300_v28 = vadd.f32 %v1375_v14, %v285_v20  ;;  %v298_v29 = vadd.f32 %v1375_v14, %v283_v21  ;;  %v299_v30 = vadd.f32 %v1375_v14, %v284_v22  ;;  %v733_v3 = vsel %vm353_vm0, %v1395_v58, 0 }
  0x16   : > { %v301_v31 = vadd.f32 %v1375_v14, %v286_v23  ;;  %v302_v32 = vadd.f32 %v1375_v14, %v287_v24  ;;  %v303_v33 = vadd.f32 %v1375_v14, %v288_v25  ;;  %v304_v34 = vadd.f32 %v1375_v14, %v289_v26  ;;  %306 = vst.msk [vmem:[#allocation2 + $0x11] sm:$0xff] %vm237_vm1, %v297_v27  ;;  %v1400_v7 = vld [vmem:[%s1903_s3 + $0x14] sm:$0xf]  ;;  %v1405_v10 = vld [vmem:[%s1903_s3 + $0x18] sm:$0xf] }
  0x17   : > { %309 = vst.msk [vmem:[#allocation2 + $0x41] sm:$0xff] %vm237_vm1, %v300_v28  ;;  %307 = vst.msk [vmem:[#allocation2 + $0x21] sm:$0xff] %vm237_vm1, %v298_v29  ;;  %v631_v5 = vsel %vm353_vm0, %v1390_v55, 0  ;;  %v938_v19 = vsel %vm353_vm0, %v1405_v10, 0  ;;  %v835_v21 = vsel %vm353_vm0, %v1400_v7, 0 }
  0x18   : > { %308 = vst.msk [vmem:[#allocation2 + $0x31] sm:$0xff] %vm237_vm1, %v299_v30  ;;  %310 = vst.msk [vmem:[#allocation2 + $0x51] sm:$0xff] %vm237_vm1, %v301_v31  ;;  %v327_v35 = vld [vmem:[#allocation2 + $0x1] sm:$0xff]  ;;  %v1410_v23 = vld [vmem:[%s1903_s3 + $0x1c] sm:$0xf] }
  0x19   : > { %311 = vst.msk [vmem:[#allocation2 + $0x61] sm:$0xff] %vm237_vm1, %v302_v32  ;;  %312 = vst.msk [vmem:[#allocation2 + $0x71] sm:$0xff] %vm237_vm1, %v303_v33  ;;  %v502_v37 = vld [vmem:[#allocation2 + $0x2] sm:$0xff]  ;;  %v1040_v33 = vsel %vm353_vm0, %v1410_v23, 0 }
  0x1a   : > { %313 = vst.msk [vmem:[#allocation2 + $0x81] sm:$0xff] %vm237_vm1, %v304_v34  ;;  %v1415_v25 = vld [vmem:[%s1903_s3 + $0x20] sm:$0xf]  ;;  %v918_v34 = vld [vmem:[#allocation2 + $0x90] sm:$0xff] }
  0x1b   : > { %v1142_v31 = vsel %vm353_vm0, %v1415_v25, 0 }
  0x1d   : > { %v1706_v38 = vld [vmem:[#allocation2 + $0x11] sm:$0xff] }
  0x1e   : > { %v1708_v39 = vld [vmem:[#allocation2 + $0x41] sm:$0xff]  ;;  %v335_v41 = vpack.c.bf16 %v1706_v38, %v327_v35  ;;  %v315_v49 = vld [vmem:[#allocation2 + $0x10] sm:$0xff] }
  0x1f   : > { %v329_v40 = vld [vmem:[#allocation2 + $0x21] sm:$0xff]  ;;  %v1711_v42 = vld [vmem:[#allocation2 + $0x51] sm:$0xff]  ;;  %v322_v53 = vpack.c.bf16 %v315_v49, %v314_v36 }
  0x20   : > { %v1713_v43 = vld [vmem:[#allocation2 + $0x31] sm:$0xff]  ;;  %v1715_v44 = vld [vmem:[#allocation2 + $0x61] sm:$0xff]  ;;  %v1719_v45 = vpack.c.bf16 %v1711_v42, %v1708_v39  ;;  %1490 = vmatprep.mubr.msk.bf16.mxu0 %vm237_vm1, %v335_v41  ;;  %v714_v15 = vpack.c.bf16 %v329_v40, %v1706_v38 }
  0x21   : > { %v1722_v46 = vpack.c.bf16 %v1713_v43, %v329_v40  ;;  %v1724_v47 = vld [vmem:[#allocation2 + $0x71] sm:$0xff]  ;;  %v1745_v56 = vld [vmem:[#allocation2 + $0x22] sm:$0xff]  ;;  %v715_v17 = vpack.c.bf16 %v1708_v39, %v1713_v43  ;;  %v716_v22 = vpack.c.bf16 %v1715_v44, %v1711_v42 }
  0x22   : > { %v1727_v50 = vld [vmem:[#allocation2 + $0x12] sm:$0xff]  ;;  %v1732_v51 = vpack.c.bf16 %v1724_v47, %v1715_v44  ;;  %1494 = vmatprep.mubr.msk.bf16.mxu1 %vm237_vm1, %v1719_v45  ;;  %v316_v59 = vld [vmem:[#allocation2 + $0x20] sm:$0xff] }
  0x23   : > { %v510_v54 = vpack.c.bf16 %v1727_v50, %v502_v37  ;;  %1491 = vmatmul.mubr.msk.bf16.vlgmr.msra.gmra.mxu0 %vm237_vm1, %v1722_v46  ;;  %v1747_v57 = vld [vmem:[#allocation2 + $0x32] sm:$0xff]  ;;  %v318_v61 = vld [vmem:[#allocation2 + $0x40] sm:$0xff]  ;;  %v612_v16 = vpack.c.bf16 %v316_v59, %v315_v49  ;;  %v816_v29 = vpack.c.bf16 %v1745_v56, %v1727_v50 }
  0x24   : > { %1495 = vmatmul.mubr.msk.bf16.vlgmr.msra.gmra.mxu1 %vm237_vm1, %v1732_v51  ;;  %1509 = vmatpush3.bf16.msra.mxu0 %v529_v48  ;;  %v317_v60 = vld [vmem:[#allocation2 + $0x30] sm:$0xff]  ;;  %v1757_v63 = vpack.c.bf16 %v1747_v57, %v1745_v56  ;;  %v506_v0 = vld [vmem:[#allocation2 + $0x42] sm:$0xff] }
  0x25   : > { %1499 = vmatpush3.bf16.msra.mxu1 %v435_v52  ;;  %1500 = vmatprep.mubr.msk.bf16.mxu1 %vm237_vm1, %v322_v53  ;;  %v319_v62 = vld [vmem:[#allocation2 + $0x50] sm:$0xff]  ;;  %v323_v2 = vpack.c.bf16 %v317_v60, %v316_v59  ;;  %v508_v8 = vld [vmem:[#allocation2 + $0x62] sm:$0xff]  ;;  %v613_v18 = vpack.c.bf16 %v318_v61, %v317_v60  ;;  %v817_v30 = vpack.c.bf16 %v506_v0, %v1747_v57 }
  0x26   : > { %1510 = vmatprep.mubr.msk.bf16.mxu0 %vm237_vm1, %v510_v54  ;;  %1584 = vmatprep.subr.msk.bf16.mxu1 %vm353_vm0, %v1390_v55  ;;  %v1760_v1 = vld [vmem:[#allocation2 + $0x52] sm:$0xff]  ;;  %v324_v4 = vpack.c.bf16 %v319_v62, %v318_v61  ;;  %v320_v11 = vld [vmem:[#allocation2 + $0x60] sm:$0xff] }
  0x27   : > { %1585 = vmatprep.subr.msk.bf16.mxu0 %vm353_vm0, %v1395_v58  ;;  %v1765_v6 = vpack.c.bf16 %v1760_v1, %v506_v0  ;;  %v509_v9 = vld [vmem:[#allocation2 + $0x72] sm:$0xff]  ;;  %v614_v20 = vpack.c.bf16 %v320_v11, %v319_v62  ;;  %v713_v24 = vld [vmem:[#allocation2 + $0x81] sm:$0xff]  ;;  %v818_v32 = vpack.c.bf16 %v508_v8, %v1760_v1 }
  0x28   : > { %v321_v12 = vld [vmem:[#allocation2 + $0x70] sm:$0xff]  ;;  %v513_v13 = vpack.c.bf16 %v509_v9, %v508_v8  ;;  %v611_v26 = vld [vmem:[#allocation2 + $0x80] sm:$0xff]  ;;  %v717_v27 = vpack.c.bf16 %v713_v24, %v1724_v47 }
  0x29   : > { %v325_v14 = vpack.c.bf16 %v321_v12, %v320_v11  ;;  %v615_v28 = vpack.c.bf16 %v611_v26, %v321_v12  ;;  %v815_v35 = vld [vmem:[#allocation2 + $0x82] sm:$0xff]  ;;  %v922_v36 = vpack.c.bf16 %v918_v34, %v611_v26  ;;  %v1122_v38 = vld [vmem:[#allocation2 + $0x92] sm:$0xff] }
  0x2a   : > { %v819_v37 = vpack.c.bf16 %v815_v35, %v509_v9  ;;  %v1020_v39 = vld [vmem:[#allocation2 + $0x91] sm:$0xff]  ;;  %v1126_v40 = vpack.c.bf16 %v1122_v38, %v815_v35 }
  0x2b   : > { %1511 = vmatmul.mubr.msk.bf16.vlgmr.msra.gmra.mxu0 %vm237_vm1, %v1757_v63  ;;  %v1024_v41 = vpack.c.bf16 %v1020_v39, %v713_v24 }
  0x2c   : > { %1501 = vmatmul.mubr.msk.bf16.vlgmr.msra.gmra.mxu1 %vm237_vm1, %v323_v2  ;;  %1529 = vmatpush3.bf16.msra.mxu0 %v733_v3 }
  0x2d   : > { %1519 = vmatpush3.bf16.msra.mxu1 %v631_v5  ;;  %1504 = vmatprep.mubr.msk.bf16.mxu1 %vm237_vm1, %v324_v4 }
  0x2e   : > { %1514 = vmatprep.mubr.msk.bf16.mxu0 %vm237_vm1, %v1765_v6  ;;  %1586 = vmatprep.subr.msk.bf16.mxu1 %vm353_vm0, %v1400_v7 }
  0x2f   : > { %1587 = vmatprep.subr.msk.bf16.mxu0 %vm353_vm0, %v1405_v10 }
  0x33   : > { %1515 = vmatmul.mubr.msk.bf16.gmra.mxu0 %vm237_vm1, %v513_v13 }
  0x34   : > { %1505 = vmatmul.mubr.msk.bf16.gmra.mxu1 %vm237_vm1, %v325_v14  ;;  %1530 = vmatprep.mubr.msk.bf16.mxu0 %vm237_vm1, %v714_v15 }
  0x35   : > { %1520 = vmatprep.mubr.msk.bf16.mxu1 %vm237_vm1, %v612_v16 }
  0x3b   : > { %1531 = vmatmul.mubr.msk.bf16.vlgmr.msra.gmra.mxu0 %vm237_vm1, %v715_v17 }
  0x3c   : > { %1521 = vmatmul.mubr.msk.bf16.vlgmr.msra.gmra.mxu1 %vm237_vm1, %v613_v18  ;;  %1549 = vmatpush3.bf16.msra.mxu0 %v938_v19 }
  0x3d   : > { %1539 = vmatpush3.bf16.msra.mxu1 %v835_v21  ;;  %1524 = vmatprep.mubr.msk.bf16.mxu1 %vm237_vm1, %v614_v20 }
  0x3e   : > { %1534 = vmatprep.mubr.msk.bf16.mxu0 %vm237_vm1, %v716_v22  ;;  %1588 = vmatprep.subr.msk.bf16.mxu1 %vm353_vm0, %v1410_v23 }
  0x3f   : > { %1589 = vmatprep.subr.msk.bf16.mxu0 %vm353_vm0, %v1415_v25 }
  0x43   : > { %1535 = vmatmul.mubr.msk.bf16.gmra.mxu0 %vm237_vm1, %v717_v27 }
  0x44   : > { %1525 = vmatmul.mubr.msk.bf16.gmra.mxu1 %vm237_vm1, %v615_v28  ;;  %1550 = vmatprep.mubr.msk.bf16.mxu0 %vm237_vm1, %v323_v2 }
  0x45   : > { %1540 = vmatprep.mubr.msk.bf16.mxu1 %vm237_vm1, %v816_v29 }
  0x4b   : > { %1551 = vmatmul.mubr.msk.bf16.vlgmr.msra.gmra.mxu0 %vm237_vm1, %v324_v4 }
  0x4c   : > { %1541 = vmatmul.mubr.msk.bf16.vlgmr.msra.gmra.mxu1 %vm237_vm1, %v817_v30  ;;  %1569 = vmatpush3.bf16.msra.mxu0 %v1142_v31 }
  0x4d   : > { %1559 = vmatpush3.bf16.msra.mxu1 %v1040_v33  ;;  %1544 = vmatprep.mubr.msk.bf16.mxu1 %vm237_vm1, %v818_v32 }
  0x4e   : > { %1554 = vmatprep.mubr.msk.bf16.mxu0 %vm237_vm1, %v325_v14 }
  0x53   : > { %1555 = vmatmul.mubr.msk.bf16.gmra.mxu0 %vm237_vm1, %v922_v36 }
  0x54   : > { %1545 = vmatmul.mubr.msk.bf16.gmra.mxu1 %vm237_vm1, %v819_v37  ;;  %1570 = vmatprep.mubr.msk.bf16.mxu0 %vm237_vm1, %v1757_v63 }
  0x55   : > { %1560 = vmatprep.mubr.msk.bf16.mxu1 %vm237_vm1, %v1722_v46 }
  0x5b   : > { %1571 = vmatmul.mubr.msk.bf16.vlgmr.msra.gmra.mxu0 %vm237_vm1, %v1765_v6 }
  0x5c   : > { %1561 = vmatmul.mubr.msk.bf16.vlgmr.msra.gmra.mxu1 %vm237_vm1, %v1719_v45  ;;  %1574 = vmatprep.mubr.msk.bf16.mxu0 %vm237_vm1, %v513_v13 }
  0x5d   : > { %1564 = vmatprep.mubr.msk.bf16.mxu1 %vm237_vm1, %v1732_v51 }
  0x63   : > { %1575 = vmatmul.mubr.msk.bf16.gmra.mxu0 %vm237_vm1, %v1126_v40 }
  0x64   : > { %1565 = vmatmul.mubr.msk.bf16.gmra.mxu1 %vm237_vm1, %v1024_v41 }
  0xe3   : > { %v1492_v42 = vpop.f32.mrf.mxu0 }
  0xe4   : > { %v1496_v43 = vpop.f32.mrf.mxu1 }
  0xe5   : > { %v391_v44 = vpop.f32.mrf.mxu0 }
  0xe6   : > { %v407_v46 = vpop.f32.mrf.mxu1 }
  0xe7   : > { %v1493_v47 = vpop.f32.mrf.mxu0 }
  0xe8   : > { %v1834_v48 = vpop.f32.mrf.mxu1 }
  0xe9   : > { %v394_v45 = vpop.f32.mrf.mxu0 }
  0xea   : > { %v1836_v49 = vpop.f32.mrf.mxu1 }
  0xeb   : > { %v1512_v50 = vpop.f32.mrf.mxu0 }
  0xec   : > { %v1502_v52 = vpop.f32.mrf.mxu1 }
  0xed   : > { %v565_v51 = vpop.f32.mrf.mxu0  ;;  %v480_v18 = vadd.f32 %v1502_v52, %v1492_v42 }
  0xee   : > { %v471_v53 = vpop.f32.mrf.mxu1 }
  0xef   : > { %v1513_v54 = vpop.f32.mrf.mxu0  ;;  %v472_v21 = vadd.f32 %v471_v53, %v391_v44  ;;  %v598_v24 = vadd.f32 %v1512_v50, %v480_v18 }
  0xf0   : > { %v1503_v55 = vpop.f32.mrf.mxu1 }
  0xf1   : > { %v568_v56 = vpop.f32.mrf.mxu0  ;;  %v483_v25 = vadd.f32 %v1503_v55, %v1493_v47  ;;  %v596_v28 = vadd.f32 %v565_v51, %v472_v21 }
  0xf2   : > { %v474_v57 = vpop.f32.mrf.mxu1 }
  0xf3   : > { %v1516_v58 = vpop.f32.mrf.mxu0  ;;  %v475_v31 = vadd.f32 %v474_v57, %v394_v45  ;;  %v599_v33 = vadd.f32 %v1513_v54, %v483_v25 }
  0xf4   : > { %v1506_v59 = vpop.f32.mrf.mxu1 }
  0xf5   : > { %v581_v60 = vpop.f32.mrf.mxu0  ;;  %v496_v34 = vadd.f32 %v1506_v59, %v1496_v43  ;;  %v597_v42 = vadd.f32 %v568_v56, %v475_v31 }
  0xf6   : > { %v487_v61 = vpop.f32.mrf.mxu1 }
  0xf7   : > { %v1838_v62 = vpop.f32.mrf.mxu0  ;;  %v488_v37 = vadd.f32 %v487_v61, %v407_v46  ;;  %v602_v50 = vadd.f32 %v1516_v58, %v496_v34 }
  0xf8   : > { %v1507_v63 = vpop.f32.mrf.mxu1 }
  0xf9   : > { %v1840_v0 = vpop.f32.mrf.mxu0  ;;  %v600_v53 = vadd.f32 %v581_v60, %v488_v37  ;;  %v499_v45 = vadd.f32 %v1507_v63, %v1834_v48 }
  0xfa   : > { %v490_v1 = vpop.f32.mrf.mxu1 }
  0xfb   : > { %v1532_v2 = vpop.f32.mrf.mxu0  ;;  %v491_v43 = vadd.f32 %v490_v1, %v1836_v49 }
  0xfc   : > { %v1522_v3 = vpop.f32.mrf.mxu1 }
  0xfd   : > { %v769_v4 = vpop.f32.mrf.mxu0  ;;  %v700_v29 = vadd.f32 %v1522_v3, %v598_v24  ;;  %v601_v60 = vadd.f32 %v1840_v0, %v491_v43 }
  0xfe   : > { %v667_v5 = vpop.f32.mrf.mxu1 }
  0xff   : > { %v1533_v6 = vpop.f32.mrf.mxu0  ;;  %v698_v35 = vadd.f32 %v667_v5, %v596_v28  ;;  %v802_v39 = vadd.f32 %v1532_v2, %v700_v29  ;;  %v603_v5 = vadd.f32 %v1838_v62, %v499_v45 }
 0x100   : > { %v1523_v7 = vpop.f32.mrf.mxu1 }
 0x101   : > { %v772_v8 = vpop.f32.mrf.mxu0  ;;  %v701_v40 = vadd.f32 %v1523_v7, %v599_v33  ;;  %v800_v47 = vadd.f32 %v769_v4, %v698_v35 }
 0x102   : > { %v670_v9 = vpop.f32.mrf.mxu1 }
 0x103   : > { %v1536_v10 = vpop.f32.mrf.mxu0  ;;  %v699_v54 = vadd.f32 %v670_v9, %v597_v42  ;;  %v803_v46 = vadd.f32 %v1533_v6, %v701_v40 }
 0x104   : > { %v1526_v11 = vpop.f32.mrf.mxu1 }
 0x105   : > { %v785_v12 = vpop.f32.mrf.mxu0  ;;  %v704_v57 = vadd.f32 %v1526_v11, %v602_v50  ;;  %v801_v7 = vadd.f32 %v772_v8, %v699_v54 }
 0x106   : > { %v683_v13 = vpop.f32.mrf.mxu1 }
 0x107   : > { %v1842_v14 = vpop.f32.mrf.mxu0  ;;  %v702_v2 = vadd.f32 %v683_v13, %v600_v53  ;;  %v806_v63 = vadd.f32 %v1536_v10, %v704_v57 }
 0x108   : > { %v1527_v15 = vpop.f32.mrf.mxu1 }
 0x109   : > { %v1844_v16 = vpop.f32.mrf.mxu0  ;;  %v804_v6 = vadd.f32 %v785_v12, %v702_v2  ;;  %v705_v11 = vadd.f32 %v1527_v15, %v603_v5 }
 0x10a   : > { %v686_v17 = vpop.f32.mrf.mxu1 }
 0x10b   : > { %v1552_v19 = vpop.f32.mrf.mxu0  ;;  %v703_v18 = vadd.f32 %v686_v17, %v601_v60 }
 0x10c   : > { %v1542_v20 = vpop.f32.mrf.mxu1 }
 0x10d   : > { %v974_v22 = vpop.f32.mrf.mxu0  ;;  %v904_v52 = vadd.f32 %v1542_v20, %v802_v39 }
 0x10e   : > { %v871_v23 = vpop.f32.mrf.mxu1 }
 0x10f   : > { %v1553_v26 = vpop.f32.mrf.mxu0  ;;  %v902_v59 = vadd.f32 %v871_v23, %v800_v47  ;;  %v1007_v3 = vadd.f32 %v1552_v19, %v904_v52  ;;  %v807_v23 = vadd.f32 %v1842_v14, %v705_v11 }
 0x110   : > { %v1543_v27 = vpop.f32.mrf.mxu1 }
 0x111   : > { %v977_v30 = vpop.f32.mrf.mxu0  ;;  %v905_v58 = vadd.f32 %v1543_v27, %v803_v46  ;;  %v1005_v49 = vadd.f32 %v974_v22, %v902_v59  ;;  %v805_v27 = vadd.f32 %v1844_v16, %v703_v18 }
 0x112   : > { %v874_v32 = vpop.f32.mrf.mxu1 }
 0x113   : > { %v1556_v36 = vpop.f32.mrf.mxu0  ;;  %v903_v20 = vadd.f32 %v874_v32, %v801_v7  ;;  %v1008_v62 = vadd.f32 %v1553_v26, %v905_v58 }
 0x114   : > { %v1546_v38 = vpop.f32.mrf.mxu1 }
 0x115   : > { %v990_v41 = vpop.f32.mrf.mxu0  ;;  %v908_v0 = vadd.f32 %v1546_v38, %v806_v63  ;;  %v1006_v24 = vadd.f32 %v977_v30, %v903_v20 }
 0x116   : > { %v887_v44 = vpop.f32.mrf.mxu1 }
 0x117   : > { %v1846_v51 = vpop.f32.mrf.mxu0  ;;  %v906_v22 = vadd.f32 %v887_v44, %v804_v6  ;;  %v1011_v26 = vadd.f32 %v1556_v36, %v908_v0 }
 0x118   : > { %v1547_v55 = vpop.f32.mrf.mxu1 }
 0x119   : > { %v993_v61 = vpop.f32.mrf.mxu0  ;;  %v909_v31 = vadd.f32 %v1547_v55, %v807_v23  ;;  %v1009_v34 = vadd.f32 %v990_v41, %v906_v22 }
 0x11a   : > { %v890_v56 = vpop.f32.mrf.mxu1 }
 0x11b   : > { %v1572_v4 = vpop.f32.mrf.mxu0  ;;  %v907_v35 = vadd.f32 %v890_v56, %v805_v27  ;;  %v1012_v42 = vadd.f32 %v1846_v51, %v909_v31 }
 0x11c   : > { %v1562_v48 = vpop.f32.mrf.mxu1 }
 0x11d   : > { %v1109_v1 = vadd.f32 %v1562_v48, %v1007_v3  ;;  %v1178_v9 = vpop.f32.mrf.mxu0  ;;  %v1010_v52 = vadd.f32 %v993_v61, %v907_v35 }
 0x11e   : > { %v1076_v13 = vpop.f32.mrf.mxu1 }
 0x11f   : > { %v1211_v8 = vadd.f32 %v1572_v4, %v1109_v1  ;;  %v1107_v19 = vadd.f32 %v1076_v13, %v1005_v49  ;;  %v1573_v10 = vpop.f32.mrf.mxu0 }
 0x120   : > { %v1563_v21 = vpop.f32.mrf.mxu1 }
 0x121   : > { %1219 = vst.msk [vmem:[%s1856_s27 + $0x10] sm:$0xff] %vm237_vm1, %v1211_v8  ;;  %v1209_v12 = vadd.f32 %v1178_v9, %v1107_v19  ;;  %v1110_v15 = vadd.f32 %v1563_v21, %v1008_v62  ;;  %v1181_v17 = vpop.f32.mrf.mxu0  ;;  %v1250_v16 = vmul.f32 %v1211_v8, %v1211_v8  ;;  %v1228_v53 = vsel %vm237_vm1, %v1211_v8, 0.0 }
 0x122   : > { %v1079_v25 = vpop.f32.mrf.mxu1 }
 0x123   : > { %1217 = vst.msk [vmem:[%s1856_s27] sm:$0xff] %vm237_vm1, %v1209_v12  ;;  %v1212_v28 = vadd.f32 %v1573_v10, %v1110_v15  ;;  %v1576_v29 = vpop.f32.mrf.mxu0  ;;  %v1108_v32 = vadd.f32 %v1079_v25, %v1006_v24  ;;  %v1248_v14 = vmul.f32 %v1209_v12, %v1209_v12  ;;  %v1225_v44 = vsel %vm237_vm1, %v1209_v12, 0.0 }
 0x124   : > { %v1566_v33 = vpop.f32.mrf.mxu1  ;;  %v1259_v2 = vsel %vm237_vm1, %v1250_v16, 0.0 }
 0x125   : > { %1220 = vst.msk [vmem:[%s1856_s27 + $0x18] sm:$0xff] %vm237_vm1, %v1212_v28  ;;  %v1113_v37 = vadd.f32 %v1566_v33, %v1011_v26  ;;  %v1194_v38 = vpop.f32.mrf.mxu0  ;;  %v1210_v30 = vadd.f32 %v1181_v17, %v1108_v32  ;;  %v1256_v55 = vsel %vm237_vm1, %v1248_v14, 0.0  ;;  %v1251_v51 = vmul.f32 %v1212_v28, %v1212_v28 }
 0x126   : > { %v1092_v39 = vpop.f32.mrf.mxu1  ;;  %v1230_v61 = vsel %vm237_vm1, %v1212_v28, 0.0 }
 0x127   : > { %v1215_v36 = vadd.f32 %v1576_v29, %v1113_v37  ;;  %v1111_v40 = vadd.f32 %v1092_v39, %v1009_v34  ;;  %1218 = vst.msk [vmem:[%s1856_s27 + $0x8] sm:$0xff] %vm237_vm1, %v1210_v30  ;;  %v1226_v41 = vsel %vm237_vm1, %v1210_v30, 0.0  ;;  %v1249_v50 = vmul.f32 %v1210_v30, %v1210_v30  ;;  %v1577_v54 = vpop.f32.mrf.mxu0 }
 0x128   : > { %v1567_v47 = vpop.f32.mrf.mxu1  ;;  %v1227_v45 = vadd.f32 %v1226_v41, %v1225_v44  ;;  %v1261_v63 = vsel %vm237_vm1, %v1251_v51, 0.0 }
 0x129   : > { %1223 = vst.msk [vmem:[%s1856_s27 + $0x30] sm:$0xff] %vm237_vm1, %v1215_v36  ;;  %v1213_v43 = vadd.f32 %v1194_v38, %v1111_v40  ;;  %v1257_v46 = vsel %vm237_vm1, %v1249_v50, 0.0  ;;  %v1114_v57 = vadd.f32 %v1567_v47, %v1012_v42  ;;  %v1197_v48 = vpop.f32.mrf.mxu0  ;;  %v1254_v11 = vmul.f32 %v1215_v36, %v1215_v36 }
 0x12a   : > { %v1095_v59 = vpop.f32.mrf.mxu1  ;;  %v1229_v56 = vadd.f32 %v1228_v53, %v1227_v45  ;;  %v1258_v3 = vadd.f32 %v1257_v46, %v1256_v55  ;;  %v1236_v8 = vsel %vm237_vm1, %v1215_v36, 0.0 }
 0x12b   : > { %1221 = vst.msk [vmem:[%s1856_s27 + $0x20] sm:$0xff] %vm237_vm1, %v1213_v43  ;;  %v1252_v58 = vmul.f32 %v1213_v43, %v1213_v43  ;;  %v1216_v4 = vadd.f32 %v1577_v54, %v1114_v57  ;;  %v1112_v5 = vadd.f32 %v1095_v59, %v1010_v52  ;;  %v1232_v49 = vsel %vm237_vm1, %v1213_v43, 0.0 }
 0x12c   : > { %v1260_v60 = vadd.f32 %v1259_v2, %v1258_v3  ;;  %v1231_v7 = vadd.f32 %v1230_v61, %v1229_v56  ;;  %v1267_v12 = vsel %vm237_vm1, %v1254_v11, 0.0 }
 0x12d   : > { %1224 = vst.msk [vmem:[%s1856_s27 + $0x38] sm:$0xff] %vm237_vm1, %v1216_v4  ;;  %v1214_v1 = vadd.f32 %v1197_v48, %v1112_v5  ;;  %v1263_v18 = vsel %vm237_vm1, %v1252_v58, 0.0  ;;  %v1255_v19 = vmul.f32 %v1216_v4, %v1216_v4  ;;  %v1238_v15 = vsel %vm237_vm1, %v1216_v4, 0.0 }
 0x12e   : > { %v1233_v9 = vadd.f32 %v1232_v49, %v1231_v7  ;;  %v1262_v6 = vadd.f32 %v1261_v63, %v1260_v60 }
 0x12f   : > { %1222 = vst.msk [vmem:[%s1856_s27 + $0x28] sm:$0xff] %vm237_vm1, %v1214_v1  ;;  %v1234_v20 = vsel %vm237_vm1, %v1214_v1, 0.0  ;;  %v1253_v13 = vmul.f32 %v1214_v1, %v1214_v1  ;;  %v1269_v24 = vsel %vm237_vm1, %v1255_v19, 0.0 }
 0x130   : > { %v1264_v62 = vadd.f32 %v1263_v18, %v1262_v6  ;;  %v1235_v0 = vadd.f32 %v1234_v20, %v1233_v9 }
 0x131   : > { %v1265_v10 = vsel %vm237_vm1, %v1253_v13, 0.0 }
 0x132   : > { %v1237_v21 = vadd.f32 %v1236_v8, %v1235_v0  ;;  %v1266_v22 = vadd.f32 %v1265_v10, %v1264_v62 }
 0x134   : > { %v1239_v17 = vadd.f32 %v1238_v15, %v1237_v21  ;;  %v1268_v23 = vadd.f32 %v1267_v12, %v1266_v22 }
 0x136   : > { %v1240_v25 = vrot.slane %v1239_v17, 4  ;;  %v1270_v27 = vadd.f32 %v1269_v24, %v1268_v23 }
 0x138   : > { %v1241_v26 = vadd.f32 %v1240_v25, %v1239_v17  ;;  %v1271_v28 = vrot.slane %v1270_v27, 4 }
 0x13a   : > { %v1242_v29 = vrot.slane %v1241_v26, 2  ;;  %v1272_v31 = vadd.f32 %v1271_v28, %v1270_v27 }
 0x13c   : > { %v1243_v32 = vadd.f32 %v1242_v29, %v1241_v26  ;;  %v1273_v33 = vrot.slane %v1272_v31, 2 }
 0x13e   : > { %v1244_v34 = vrot.slane %v1243_v32, 1  ;;  %v1274_v35 = vadd.f32 %v1273_v33, %v1272_v31 }
 0x140   : > { %v1245_v37 = vadd.f32 %v1244_v34, %v1243_v32  ;;  %v1275_v38 = vrot.slane %v1274_v35, 1 }
 0x142   : > { %1247 = vst.msk [vmem:[%s235_s6] sm:$0x1] %vm1246_vm3, %v1245_v37  ;;  %v1276_v14 = vadd.f32 %v1275_v38, %v1274_v35 }
 0x144   : > { %1277 = vst.msk [vmem:[%s235_s6 + $0x1] sm:$0x1] %vm1246_vm3, %v1276_v14 }
 0x145 PF: > { %s16_s18 = sadd.s32 1, %s1605_s18  }
 0x146   : > { %p13_p4 = scmp.ge.s32.totalorder %s16_s18, 4  }
 0x148   :  { %15 = sbr.rel (!%p13_p4) target bundleno = 1 (0x1), region = 88 }

</bundles_post_ra>
